<compile_context>
chip_gen: v7x
topology: tpu7x:2x2x1
jax: 0.10.0
libtpu: 0.0.40
codegen_flags: <defaults>
</compile_context>

<pallas_src>
import functools

import jax
import jax.numpy as jnp
from jax import lax
from jax.experimental import pallas as pl
from jax.experimental.pallas import tpu as pltpu


OUT_DIM = 30 * 91  # 2730


# ----------------------------------------------------------------------------
# Fused bidirectional LSTM recurrence (fwd + bwd in one (BP, 2H) state)
# ----------------------------------------------------------------------------
def _bilstm_steps(pf_ref, pb_ref, whh_ref, T, BP, H, hseq_ref=None):
    """Fused fwd+bwd LSTM recurrence over T static steps.

    pf_ref : (T*BP, 8H) VMEM scratch; rows [t*BP, (t+1)*BP) hold the fwd-direction
             input projection for original time t (nonzero only in fwd gate columns;
             combined biases for BOTH directions folded in here).
    pb_ref : (T*BP, 8H) VMEM scratch; rows for time s hold the bwd-direction input
             projection (nonzero only in bwd gate columns).
    whh_ref: (2H, 8H) block-diagonal recurrent weights, packed gate layout
             [i_f,i_b, f_f,f_b, o_f,o_b, g_f,g_b].
    Returns the final h (BP, 2H) = [h_fwd_final | h_bwd_final].
    If hseq_ref is given, rows [t*BP,(t+1)*BP) get h after loop step t
    (fwd half = output at time t, bwd half = output at time T-1-t).
    """
    H2 = 2 * H
    h = jnp.zeros((BP, H2), jnp.float32)
    c = jnp.zeros((BP, H2), jnp.float32)
    for t in range(T):  # T is small & static: fully unrolled
        gates = (pf_ref[pl.ds(t * BP, BP), :]
                 + pb_ref[pl.ds((T - 1 - t) * BP, BP), :]
                 + jnp.dot(h, whh_ref[...], preferred_element_type=jnp.float32))
        sg = jax.nn.sigmoid(gates[:, 0:3 * H2])        # i, f, o only (no wasted g cols)
        i_g = sg[:, 0:H2]
        f_g = sg[:, H2:2 * H2]
        o_g = sg[:, 2 * H2:3 * H2]
        g_g = jnp.tanh(gates[:, 3 * H2:4 * H2])
        c = f_g * c + i_g * g_g
        h = o_g * jnp.tanh(c)
        if hseq_ref is not None:
            hseq_ref[pl.ds(t * BP, BP), :] = h
    return h


# ----------------------------------------------------------------------------
# Fused Pallas kernel: both LSTM layers (both directions) + fc_1 / ReLU / fc
# ----------------------------------------------------------------------------
def multinet_kernel(x_ref, w0_ref, b0_ref, whh0_ref,
                    w1_ref, b1_ref, whh1_ref,
                    wfc1_ref, bfc1_ref, wfc_hbm_ref, bfc_ref,
                    out_ref, hseq_ref, pf_ref, pb_ref, wfc_vmem, wfc_sem,
                    *, T, BP):
    H8 = whh0_ref.shape[1]          # 8H
    H = H8 // 8
    H2 = 2 * H
    B = out_ref.shape[0]

    # Kick off the large fc-weight DMA immediately; it overlaps the serial recurrence.
    wfc_copy = pltpu.make_async_copy(wfc_hbm_ref, wfc_vmem, wfc_sem)
    wfc_copy.start()

    # ===== layer 0: ONE fused input-projection matmul for both directions =====
    proj0 = jnp.dot(x_ref[...], w0_ref[...], preferred_element_type=jnp.float32)  # (T*BP, 16H)
    pf_ref[...] = proj0[:, 0:H8] + b0_ref[...]      # fwd cols (+ all biases)
    pb_ref[...] = proj0[:, H8:2 * H8]               # bwd cols
    _bilstm_steps(pf_ref, pb_ref, whh0_ref, T, BP, H, hseq_ref)
    # TODO(synk): Dropout(0.2) on the layer-0 output is identity (eval semantics).

    # ===== layer 1: ONE fused input-projection matmul from the VMEM hseq slab =====
    # hseq rows for step t hold [h0_fwd(t) | h0_bwd(T-1-t)]; the packed (2H, 16H)
    # weight is arranged so the two 8H halves of the product are exactly P and Q with
    # P[t] + Q[T-1-t] == layer0_output(t) @ Wih1 for both directions at step t.
    proj1 = jnp.dot(hseq_ref[...], w1_ref[...], preferred_element_type=jnp.float32)  # (T*BP, 16H)
    pf_ref[...] = proj1[:, 0:H8] + b1_ref[...]      # P  (scratch reused from layer 0)
    pb_ref[...] = proj1[:, H8:2 * H8]               # Q
    hn = _bilstm_steps(pf_ref, pb_ref, whh1_ref, T, BP, H, None)   # (BP, 2H)
    # hn == torch.cat((hn[-2], hn[-1]), dim=1)  (fwd final | bwd final)
    # TODO(synk): Dropout(0.2) on hn is identity (eval semantics).

    # ===== head: fc_1 + ReLU + fc (fc weight arrives via the overlapped DMA) =====
    h1 = jnp.maximum(
        jnp.dot(hn, wfc1_ref[...], preferred_element_type=jnp.float32) + bfc1_ref[...],
        0.0)
    wfc_copy.wait()
    logits = jnp.dot(h1, wfc_vmem[...], preferred_element_type=jnp.float32) + bfc_ref[...]
    out_ref[...] = logits[0:B, :]   # lane-dense (2816-wide) store; 2730-slice in wrapper


# ----------------------------------------------------------------------------
# Wrapper
# ----------------------------------------------------------------------------
_VMEM = pl.BlockSpec(memory_space=pltpu.MemorySpace.VMEM)
_ANY = pl.BlockSpec(memory_space=pl.ANY)


@jax.jit
def multinet_forward(x, p):
    """x: (B, T, 2) float32, batch-first like the PyTorch module. Eval-mode forward."""
    B, T, I = x.shape
    H = p["wfc1"].shape[1]
    out_pad = p["wfc"].shape[1]                     # 2816 = 22 * 128
    BP = ((B + 7) // 8) * 8                         # sublane-aligned batch (>= 8)

    # Time-major, sublane-padded, flattened input — free HBM-level XLA ops.
    x_flat = jnp.pad(jnp.transpose(x, (1, 0, 2)),
                     ((0, 0), (0, BP - B), (0, 0))).reshape(T * BP, I)

    kernel = functools.partial(multinet_kernel, T=T, BP=BP)
    out = pl.pallas_call(
        kernel,
        in_specs=[_VMEM] * 9 + [_ANY, _VMEM],       # wfc stays in HBM; DMA'd manually
        out_specs=_VMEM,
        out_shape=jax.ShapeDtypeStruct((B, out_pad), jnp.float32),
        scratch_shapes=[
            pltpu.VMEM((T * BP, 2 * H), jnp.float32),   # layer-0 output sequence
            pltpu.VMEM((T * BP, 8 * H), jnp.float32),   # fwd projections (reused by L1: P)
            pltpu.VMEM((T * BP, 8 * H), jnp.float32),   # bwd projections (reused by L1: Q)
            pltpu.VMEM((H, out_pad), jnp.float32),      # fc weight landing buffer
            pltpu.SemaphoreType.DMA(()),                # fc weight DMA completion
        ],
    )(x_flat, p["w0"], p["b0"], p["whh0"],
      p["w1"], p["b1"], p["whh1"],
      p["wfc1"], p["bfc1"], p["wfc"], p["bfc"])
    return out[:, :OUT_DIM]


# ----------------------------------------------------------------------------
# Parameters: PyTorch-style raw init + packing into the fused kernel layout
# ----------------------------------------------------------------------------
def init_params(key, hidden_dim):
    H = hidden_dim

    def uni(k, shape, bound):
        return jax.random.uniform(k, shape, jnp.float32, -bound, bound)

    keys = iter(jax.random.split(key, 32))
    kl = 1.0 / float(H) ** 0.5

    def lstm_dir(in_dim):
        return dict(
            w_ih=uni(next(keys), (4 * H, in_dim), kl),
            w_hh=uni(next(keys), (4 * H, H), kl),
            b_ih=uni(next(keys), (4 * H,), kl),
            b_hh=uni(next(keys), (4 * H,), kl))

    raw = dict(l0_f=lstm_dir(2), l0_b=lstm_dir(2),
               l1_f=lstm_dir(2 * H), l1_b=lstm_dir(2 * H))
    k1 = 1.0 / float(2 * H) ** 0.5
    raw["fc1_w"] = uni(next(keys), (H, 2 * H), k1)
    raw["fc1_b"] = uni(next(keys), (H,), k1)
    k2 = 1.0 / float(H) ** 0.5
    raw["fc_w"] = uni(next(keys), (OUT_DIM, H), k2)
    raw["fc_b"] = uni(next(keys), (OUT_DIM,), k2)
    return raw


def pack_params(raw, hidden_dim):
    """Rearrange PyTorch-layout weights into the fused kernel layout."""
    H = hidden_dim
    GATE_ORDER = (0, 1, 3, 2)   # PyTorch [i, f, g, o]  ->  packed [i, f, o, g]

    def interleave(w_t, direction):
        # w_t: (in, 4H) gate-major [i|f|g|o] -> (in, 8H) packed layout
        # [i_f,i_b, f_f,f_b, o_f,o_b, g_f,g_b]; zeros in the other direction's cols.
        in_dim = w_t.shape[0]
        z = jnp.zeros((in_dim, H), w_t.dtype)
        blocks = []
        for gi in GATE_ORDER:
            blk = w_t[:, gi * H:(gi + 1) * H]
            blocks += ([blk, z] if direction == 0 else [z, blk])
        return jnp.concatenate(blocks, axis=1)

    def pack_layer(pf, pb):
        wf = interleave(pf["w_ih"].T, 0)                       # (in, 8H)
        wb = interleave(pb["w_ih"].T, 1)                       # (in, 8H)
        whh = jnp.concatenate([interleave(pf["w_hh"].T, 0),    # (2H, 8H) block-diagonal
                               interleave(pb["w_hh"].T, 1)], axis=0)
        bf = (pf["b_ih"] + pf["b_hh"]).reshape(1, 4 * H)
        bb = (pb["b_ih"] + pb["b_hh"]).reshape(1, 4 * H)
        b = interleave(bf, 0) + interleave(bb, 1)              # (1, 8H)
        return wf, wb, b, whh

    w0f, w0b, b0, whh0 = pack_layer(raw["l0_f"], raw["l0_b"])
    w1f, w1b, b1, whh1 = pack_layer(raw["l1_f"], raw["l1_b"])

    # Layer 0: fuse fwd/bwd input projections side by side -> (I, 16H).
    w0 = jnp.concatenate([w0f, w0b], axis=1)
    # Layer 1: one (2H, 16H) weight so  hseq @ w1 = [P | Q]  with
    #   hseq rows = [h0_fwd(t) | h0_bwd(T-1-t)].
    w1 = jnp.concatenate([
        jnp.concatenate([w1f[0:H], w1b[0:H]], axis=1),
        jnp.concatenate([w1b[H:2 * H], w1f[H:2 * H]], axis=1)], axis=0)

    out_pad = ((OUT_DIM + 127) // 128) * 128                   # 2816 = 22 * 128
    wfc_pad = jnp.pad(raw["fc_w"].T, ((0, 0), (0, out_pad - OUT_DIM)))
    bfc_pad = jnp.pad(raw["fc_b"], (0, out_pad - OUT_DIM)).reshape(1, out_pad)

    return dict(w0=w0, b0=b0, whh0=whh0,
                w1=w1, b1=b1, whh1=whh1,
                wfc1=raw["fc1_w"].T, bfc1=raw["fc1_b"].reshape(1, H),
                wfc=wfc_pad, bfc=bfc_pad)


# ----------------------------------------------------------------------------
# Pure-JAX reference (straightforward, from the raw PyTorch-layout params)
# ----------------------------------------------------------------------------
def _lstm_dir_ref(x_tm, p):
    T, B, _ = x_tm.shape
    H = p["w_hh"].shape[1]
    wih_t = p["w_ih"].T
    whh_t = p["w_hh"].T
    b = (p["b_ih"] + p["b_hh"])[None, :]
    hp = jax.lax.Precision.HIGHEST

    def step(carry, x_t):
        h, c = carry
        g = jnp.dot(x_t, wih_t, precision=hp) + jnp.dot(h, whh_t, precision=hp) + b
        i = jax.nn.sigmoid(g[:, 0:H])
        f = jax.nn.sigmoid(g[:, H:2 * H])
        gg = jnp.tanh(g[:, 2 * H:3 * H])
        o = jax.nn.sigmoid(g[:, 3 * H:4 * H])
        c = f * c + i * gg
        h = o * jnp.tanh(c)
        return (h, c), h

    (h, _), out = lax.scan(step, (jnp.zeros((B, H)), jnp.zeros((B, H))), x_tm)
    return out, h


def multinet_ref(x, raw):
    hp = jax.lax.Precision.HIGHEST
    x_tm = jnp.transpose(x, (1, 0, 2))
    of, _ = _lstm_dir_ref(x_tm, raw["l0_f"])
    ob_r, _ = _lstm_dir_ref(x_tm[::-1], raw["l0_b"])
    l0 = jnp.concatenate([of, ob_r[::-1]], axis=-1)
    _, hf = _lstm_dir_ref(l0, raw["l1_f"])
    _, hb = _lstm_dir_ref(l0[::-1], raw["l1_b"])
    hn = jnp.concatenate([hf, hb], axis=1)
    h1 = jnp.maximum(jnp.dot(hn, raw["fc1_w"].T, precision=hp) + raw["fc1_b"], 0.0)
    return jnp.dot(h1, raw["fc_w"].T, precision=hp) + raw["fc_b"]


# ----------------------------------------------------------------------------
if __name__ == "__main__":
    hidden_dim = 32
    batch = 2
    seq = 8

    key = jax.random.PRNGKey(0)
    k_x, k_p = jax.random.split(key)
    x = jax.random.normal(k_x, (batch, seq, 2), dtype=jnp.float32)

    raw = init_params(k_p, hidden_dim)
    packed = pack_params(raw, hidden_dim)

    out = jax.block_until_ready(multinet_forward(x, packed))
    assert out.shape == (batch, OUT_DIM), out.shape
    assert out.dtype == jnp.float32

    ref = jax.block_until_ready(multinet_ref(x, raw))
    max_err = float(jnp.max(jnp.abs(out - ref)))
    assert max_err < 5e-3, max_err

    print("KERNEL_OK")
</pallas_src>

<mosaic_0001>
module attributes {stable_mosaic.version = 11 : i64} {
  func.func @multinet_kernel(%arg0: memref<64x2xf32, #tpu.memory_space<vmem>>, %arg1: memref<2x512xf32, #tpu.memory_space<vmem>>, %arg2: memref<1x256xf32, #tpu.memory_space<vmem>>, %arg3: memref<64x256xf32, #tpu.memory_space<vmem>>, %arg4: memref<64x512xf32, #tpu.memory_space<vmem>>, %arg5: memref<1x256xf32, #tpu.memory_space<vmem>>, %arg6: memref<64x256xf32, #tpu.memory_space<vmem>>, %arg7: memref<64x32xf32, #tpu.memory_space<vmem>>, %arg8: memref<1x32xf32, #tpu.memory_space<vmem>>, %arg9: memref<32x2816xf32, #tpu.memory_space<any>>, %arg10: memref<1x2816xf32, #tpu.memory_space<vmem>>, %arg11: memref<2x2816xf32, #tpu.memory_space<vmem>>, %arg12: memref<64x64xf32, #tpu.memory_space<vmem>>, %arg13: memref<64x256xf32, #tpu.memory_space<vmem>>, %arg14: memref<64x256xf32, #tpu.memory_space<vmem>>, %arg15: memref<32x2816xf32, #tpu.memory_space<vmem>>, %arg16: memref<!tpu.dma_semaphore, #tpu.memory_space<semaphore_mem>>) attributes {dimension_semantics = [], scalar_prefetch = 0 : i64, scratch_operands = 5 : i64, tpu.core_type = #tpu.core_type<tc>} {
    tpu.enqueue_dma source(%arg9 : memref<32x2816xf32, #tpu.memory_space<any>>) target(%arg15 : memref<32x2816xf32, #tpu.memory_space<vmem>>) target_semaphore(%arg16 : memref<!tpu.dma_semaphore, #tpu.memory_space<semaphore_mem>>)
    %c0 = arith.constant 0 : index
    %c0_0 = arith.constant 0 : index
    %0 = vector.load %arg0[%c0, %c0_0] : memref<64x2xf32, #tpu.memory_space<vmem>>, vector<64x2xf32>
    %c0_1 = arith.constant 0 : index
    %c0_2 = arith.constant 0 : index
    %1 = vector.load %arg1[%c0_1, %c0_2] : memref<2x512xf32, #tpu.memory_space<vmem>>, vector<2x512xf32>
    %cst = arith.constant dense<0.000000e+00> : vector<64x512xf32>
    %2 = tpu.matmul %0, %1, %cst {dimension_numbers = #tpu.dot_dimension_numbers<[1], [0], [0], [1], [0, 0, 1, 1], [], []>} : vector<64x2xf32>, vector<2x512xf32>, vector<64x512xf32> -> vector<64x512xf32>
    %3 = vector.extract_strided_slice %2 {offsets = [0, 0], sizes = [64, 256], strides = [1, 1]} : vector<64x512xf32> to vector<64x256xf32>
    %c0_3 = arith.constant 0 : index
    %c0_4 = arith.constant 0 : index
    %4 = vector.load %arg2[%c0_3, %c0_4] : memref<1x256xf32, #tpu.memory_space<vmem>>, vector<1x256xf32>
    %5 = vector.broadcast %4 : vector<1x256xf32> to vector<64x256xf32>
    %6 = arith.addf %3, %5 : vector<64x256xf32>
    %c0_5 = arith.constant 0 : index
    %c0_6 = arith.constant 0 : index
    %7 = vector.load %arg13[%c0_5, %c0_6] : memref<64x256xf32, #tpu.memory_space<vmem>>, vector<64x256xf32>
    tpu.vector_store %arg13[%c0_5, %c0_6], %6 {strides = array<i32>} : memref<64x256xf32, #tpu.memory_space<vmem>>, vector<64x256xf32>,
    %8 = vector.extract_strided_slice %2 {offsets = [0, 256], sizes = [64, 256], strides = [1, 1]} : vector<64x512xf32> to vector<64x256xf32>
    %c0_7 = arith.constant 0 : index
    %c0_8 = arith.constant 0 : index
    %9 = vector.load %arg14[%c0_7, %c0_8] : memref<64x256xf32, #tpu.memory_space<vmem>>, vector<64x256xf32>
    tpu.vector_store %arg14[%c0_7, %c0_8], %8 {strides = array<i32>} : memref<64x256xf32, #tpu.memory_space<vmem>>, vector<64x256xf32>,
    %cst_9 = arith.constant 0.000000e+00 : f32
    %10 = vector.broadcast %cst_9 : f32 to vector<8x64xf32>
    %cst_10 = arith.constant 0.000000e+00 : f32
    %11 = vector.broadcast %cst_10 : f32 to vector<8x64xf32>
    %c0_11 = arith.constant 0 : index
    %c0_12 = arith.constant 0 : index
    %12 = vector.load %arg13[%c0_11, %c0_12] : memref<64x256xf32, #tpu.memory_space<vmem>>, vector<8x256xf32>
    %c56 = arith.constant 56 : index
    %c0_13 = arith.constant 0 : index
    %13 = vector.load %arg14[%c56, %c0_13] : memref<64x256xf32, #tpu.memory_space<vmem>>, vector<8x256xf32>
    %14 = arith.addf %12, %13 : vector<8x256xf32>
    %c0_14 = arith.constant 0 : index
    %c0_15 = arith.constant 0 : index
    %15 = vector.load %arg3[%c0_14, %c0_15] : memref<64x256xf32, #tpu.memory_space<vmem>>, vector<64x256xf32>
    %cst_16 = arith.constant dense<0.000000e+00> : vector<8x256xf32>
    %16 = tpu.matmul %10, %15, %cst_16 {dimension_numbers = #tpu.dot_dimension_numbers<[1], [0], [0], [1], [0, 0, 1, 1], [], []>} : vector<8x64xf32>, vector<64x256xf32>, vector<8x256xf32> -> vector<8x256xf32>
    %17 = arith.addf %14, %16 : vector<8x256xf32>
    %18 = vector.extract_strided_slice %17 {offsets = [0, 0], sizes = [8, 192], strides = [1, 1]} : vector<8x256xf32> to vector<8x192xf32>
    %19 = arith.negf %18 : vector<8x192xf32>
    %20 = math.exp %19 : vector<8x192xf32>
    %cst_17 = arith.constant 1.000000e+00 : f32
    %21 = vector.broadcast %cst_17 : f32 to vector<8x192xf32>
    %22 = arith.addf %21, %20 : vector<8x192xf32>
    %23 = arith.divf %21, %22 : vector<8x192xf32>
    %24 = vector.extract_strided_slice %23 {offsets = [0, 0], sizes = [8, 64], strides = [1, 1]} : vector<8x192xf32> to vector<8x64xf32>
    %25 = vector.extract_strided_slice %23 {offsets = [0, 64], sizes = [8, 64], strides = [1, 1]} : vector<8x192xf32> to vector<8x64xf32>
    %26 = vector.extract_strided_slice %23 {offsets = [0, 128], sizes = [8, 64], strides = [1, 1]} : vector<8x192xf32> to vector<8x64xf32>
    %27 = vector.extract_strided_slice %17 {offsets = [0, 192], sizes = [8, 64], strides = [1, 1]} : vector<8x256xf32> to vector<8x64xf32>
    %28 = math.tanh %27 : vector<8x64xf32>
    %29 = arith.mulf %25, %11 : vector<8x64xf32>
    %30 = arith.mulf %24, %28 : vector<8x64xf32>
    %31 = arith.addf %29, %30 : vector<8x64xf32>
    %32 = math.tanh %31 : vector<8x64xf32>
    %33 = arith.mulf %26, %32 : vector<8x64xf32>
    %c0_18 = arith.constant 0 : index
    %c0_19 = arith.constant 0 : index
    %34 = vector.load %arg12[%c0_18, %c0_19] : memref<64x64xf32, #tpu.memory_space<vmem>>, vector<8x64xf32>
    tpu.vector_store %arg12[%c0_18, %c0_19], %33 {strides = array<i32>} : memref<64x64xf32, #tpu.memory_space<vmem>>, vector<8x64xf32>,
    %c8 = arith.constant 8 : index
    %c0_20 = arith.constant 0 : index
    %35 = vector.load %arg13[%c8, %c0_20] : memref<64x256xf32, #tpu.memory_space<vmem>>, vector<8x256xf32>
    %c48 = arith.constant 48 : index
    %c0_21 = arith.constant 0 : index
    %36 = vector.load %arg14[%c48, %c0_21] : memref<64x256xf32, #tpu.memory_space<vmem>>, vector<8x256xf32>
    %37 = arith.addf %35, %36 : vector<8x256xf32>
    %c0_22 = arith.constant 0 : index
    %c0_23 = arith.constant 0 : index
    %38 = vector.load %arg3[%c0_22, %c0_23] : memref<64x256xf32, #tpu.memory_space<vmem>>, vector<64x256xf32>
    %cst_24 = arith.constant dense<0.000000e+00> : vector<8x256xf32>
    %39 = tpu.matmul %33, %38, %cst_24 {dimension_numbers = #tpu.dot_dimension_numbers<[1], [0], [0], [1], [0, 0, 1, 1], [], []>} : vector<8x64xf32>, vector<64x256xf32>, vector<8x256xf32> -> vector<8x256xf32>
    %40 = arith.addf %37, %39 : vector<8x256xf32>
    %41 = vector.extract_strided_slice %40 {offsets = [0, 0], sizes = [8, 192], strides = [1, 1]} : vector<8x256xf32> to vector<8x192xf32>
    %42 = arith.negf %41 : vector<8x192xf32>
    %43 = math.exp %42 : vector<8x192xf32>
    %cst_25 = arith.constant 1.000000e+00 : f32
    %44 = vector.broadcast %cst_25 : f32 to vector<8x192xf32>
    %45 = arith.addf %44, %43 : vector<8x192xf32>
    %46 = arith.divf %44, %45 : vector<8x192xf32>
    %47 = vector.extract_strided_slice %46 {offsets = [0, 0], sizes = [8, 64], strides = [1, 1]} : vector<8x192xf32> to vector<8x64xf32>
    %48 = vector.extract_strided_slice %46 {offsets = [0, 64], sizes = [8, 64], strides = [1, 1]} : vector<8x192xf32> to vector<8x64xf32>
    %49 = vector.extract_strided_slice %46 {offsets = [0, 128], sizes = [8, 64], strides = [1, 1]} : vector<8x192xf32> to vector<8x64xf32>
    %50 = vector.extract_strided_slice %40 {offsets = [0, 192], sizes = [8, 64], strides = [1, 1]} : vector<8x256xf32> to vector<8x64xf32>
    %51 = math.tanh %50 : vector<8x64xf32>
    %52 = arith.mulf %48, %31 : vector<8x64xf32>
    %53 = arith.mulf %47, %51 : vector<8x64xf32>
    %54 = arith.addf %52, %53 : vector<8x64xf32>
    %55 = math.tanh %54 : vector<8x64xf32>
    %56 = arith.mulf %49, %55 : vector<8x64xf32>
    %c8_26 = arith.constant 8 : index
    %c0_27 = arith.constant 0 : index
    %57 = vector.load %arg12[%c8_26, %c0_27] : memref<64x64xf32, #tpu.memory_space<vmem>>, vector<8x64xf32>
    tpu.vector_store %arg12[%c8_26, %c0_27], %56 {strides = array<i32>} : memref<64x64xf32, #tpu.memory_space<vmem>>, vector<8x64xf32>,
    %c16 = arith.constant 16 : index
    %c0_28 = arith.constant 0 : index
    %58 = vector.load %arg13[%c16, %c0_28] : memref<64x256xf32, #tpu.memory_space<vmem>>, vector<8x256xf32>
    %c40 = arith.constant 40 : index
    %c0_29 = arith.constant 0 : index
    %59 = vector.load %arg14[%c40, %c0_29] : memref<64x256xf32, #tpu.memory_space<vmem>>, vector<8x256xf32>
    %60 = arith.addf %58, %59 : vector<8x256xf32>
    %c0_30 = arith.constant 0 : index
    %c0_31 = arith.constant 0 : index
    %61 = vector.load %arg3[%c0_30, %c0_31] : memref<64x256xf32, #tpu.memory_space<vmem>>, vector<64x256xf32>
    %cst_32 = arith.constant dense<0.000000e+00> : vector<8x256xf32>
    %62 = tpu.matmul %56, %61, %cst_32 {dimension_numbers = #tpu.dot_dimension_numbers<[1], [0], [0], [1], [0, 0, 1, 1], [], []>} : vector<8x64xf32>, vector<64x256xf32>, vector<8x256xf32> -> vector<8x256xf32>
    %63 = arith.addf %60, %62 : vector<8x256xf32>
    %64 = vector.extract_strided_slice %63 {offsets = [0, 0], sizes = [8, 192], strides = [1, 1]} : vector<8x256xf32> to vector<8x192xf32>
    %65 = arith.negf %64 : vector<8x192xf32>
    %66 = math.exp %65 : vector<8x192xf32>
    %cst_33 = arith.constant 1.000000e+00 : f32
    %67 = vector.broadcast %cst_33 : f32 to vector<8x192xf32>
    %68 = arith.addf %67, %66 : vector<8x192xf32>
    %69 = arith.divf %67, %68 : vector<8x192xf32>
    %70 = vector.extract_strided_slice %69 {offsets = [0, 0], sizes = [8, 64], strides = [1, 1]} : vector<8x192xf32> to vector<8x64xf32>
    %71 = vector.extract_strided_slice %69 {offsets = [0, 64], sizes = [8, 64], strides = [1, 1]} : vector<8x192xf32> to vector<8x64xf32>
    %72 = vector.extract_strided_slice %69 {offsets = [0, 128], sizes = [8, 64], strides = [1, 1]} : vector<8x192xf32> to vector<8x64xf32>
    %73 = vector.extract_strided_slice %63 {offsets = [0, 192], sizes = [8, 64], strides = [1, 1]} : vector<8x256xf32> to vector<8x64xf32>
    %74 = math.tanh %73 : vector<8x64xf32>
    %75 = arith.mulf %71, %54 : vector<8x64xf32>
    %76 = arith.mulf %70, %74 : vector<8x64xf32>
    %77 = arith.addf %75, %76 : vector<8x64xf32>
    %78 = math.tanh %77 : vector<8x64xf32>
    %79 = arith.mulf %72, %78 : vector<8x64xf32>
    %c16_34 = arith.constant 16 : index
    %c0_35 = arith.constant 0 : index
    %80 = vector.load %arg12[%c16_34, %c0_35] : memref<64x64xf32, #tpu.memory_space<vmem>>, vector<8x64xf32>
    tpu.vector_store %arg12[%c16_34, %c0_35], %79 {strides = array<i32>} : memref<64x64xf32, #tpu.memory_space<vmem>>, vector<8x64xf32>,
    %c24 = arith.constant 24 : index
    %c0_36 = arith.constant 0 : index
    %81 = vector.load %arg13[%c24, %c0_36] : memref<64x256xf32, #tpu.memory_space<vmem>>, vector<8x256xf32>
    %c32 = arith.constant 32 : index
    %c0_37 = arith.constant 0 : index
    %82 = vector.load %arg14[%c32, %c0_37] : memref<64x256xf32, #tpu.memory_space<vmem>>, vector<8x256xf32>
    %83 = arith.addf %81, %82 : vector<8x256xf32>
    %c0_38 = arith.constant 0 : index
    %c0_39 = arith.constant 0 : index
    %84 = vector.load %arg3[%c0_38, %c0_39] : memref<64x256xf32, #tpu.memory_space<vmem>>, vector<64x256xf32>
    %cst_40 = arith.constant dense<0.000000e+00> : vector<8x256xf32>
    %85 = tpu.matmul %79, %84, %cst_40 {dimension_numbers = #tpu.dot_dimension_numbers<[1], [0], [0], [1], [0, 0, 1, 1], [], []>} : vector<8x64xf32>, vector<64x256xf32>, vector<8x256xf32> -> vector<8x256xf32>
    %86 = arith.addf %83, %85 : vector<8x256xf32>
    %87 = vector.extract_strided_slice %86 {offsets = [0, 0], sizes = [8, 192], strides = [1, 1]} : vector<8x256xf32> to vector<8x192xf32>
    %88 = arith.negf %87 : vector<8x192xf32>
    %89 = math.exp %88 : vector<8x192xf32>
    %cst_41 = arith.constant 1.000000e+00 : f32
    %90 = vector.broadcast %cst_41 : f32 to vector<8x192xf32>
    %91 = arith.addf %90, %89 : vector<8x192xf32>
    %92 = arith.divf %90, %91 : vector<8x192xf32>
    %93 = vector.extract_strided_slice %92 {offsets = [0, 0], sizes = [8, 64], strides = [1, 1]} : vector<8x192xf32> to vector<8x64xf32>
    %94 = vector.extract_strided_slice %92 {offsets = [0, 64], sizes = [8, 64], strides = [1, 1]} : vector<8x192xf32> to vector<8x64xf32>
    %95 = vector.extract_strided_slice %92 {offsets = [0, 128], sizes = [8, 64], strides = [1, 1]} : vector<8x192xf32> to vector<8x64xf32>
    %96 = vector.extract_strided_slice %86 {offsets = [0, 192], sizes = [8, 64], strides = [1, 1]} : vector<8x256xf32> to vector<8x64xf32>
    %97 = math.tanh %96 : vector<8x64xf32>
    %98 = arith.mulf %94, %77 : vector<8x64xf32>
    %99 = arith.mulf %93, %97 : vector<8x64xf32>
    %100 = arith.addf %98, %99 : vector<8x64xf32>
    %101 = math.tanh %100 : vector<8x64xf32>
    %102 = arith.mulf %95, %101 : vector<8x64xf32>
    %c24_42 = arith.constant 24 : index
    %c0_43 = arith.constant 0 : index
    %103 = vector.load %arg12[%c24_42, %c0_43] : memref<64x64xf32, #tpu.memory_space<vmem>>, vector<8x64xf32>
    tpu.vector_store %arg12[%c24_42, %c0_43], %102 {strides = array<i32>} : memref<64x64xf32, #tpu.memory_space<vmem>>, vector<8x64xf32>,
    %c32_44 = arith.constant 32 : index
    %c0_45 = arith.constant 0 : index
    %104 = vector.load %arg13[%c32_44, %c0_45] : memref<64x256xf32, #tpu.memory_space<vmem>>, vector<8x256xf32>
    %c24_46 = arith.constant 24 : index
    %c0_47 = arith.constant 0 : index
    %105 = vector.load %arg14[%c24_46, %c0_47] : memref<64x256xf32, #tpu.memory_space<vmem>>, vector<8x256xf32>
    %106 = arith.addf %104, %105 : vector<8x256xf32>
    %c0_48 = arith.constant 0 : index
    %c0_49 = arith.constant 0 : index
    %107 = vector.load %arg3[%c0_48, %c0_49] : memref<64x256xf32, #tpu.memory_space<vmem>>, vector<64x256xf32>
    %cst_50 = arith.constant dense<0.000000e+00> : vector<8x256xf32>
    %108 = tpu.matmul %102, %107, %cst_50 {dimension_numbers = #tpu.dot_dimension_numbers<[1], [0], [0], [1], [0, 0, 1, 1], [], []>} : vector<8x64xf32>, vector<64x256xf32>, vector<8x256xf32> -> vector<8x256xf32>
    %109 = arith.addf %106, %108 : vector<8x256xf32>
    %110 = vector.extract_strided_slice %109 {offsets = [0, 0], sizes = [8, 192], strides = [1, 1]} : vector<8x256xf32> to vector<8x192xf32>
    %111 = arith.negf %110 : vector<8x192xf32>
    %112 = math.exp %111 : vector<8x192xf32>
    %cst_51 = arith.constant 1.000000e+00 : f32
    %113 = vector.broadcast %cst_51 : f32 to vector<8x192xf32>
    %114 = arith.addf %113, %112 : vector<8x192xf32>
    %115 = arith.divf %113, %114 : vector<8x192xf32>
    %116 = vector.extract_strided_slice %115 {offsets = [0, 0], sizes = [8, 64], strides = [1, 1]} : vector<8x192xf32> to vector<8x64xf32>
    %117 = vector.extract_strided_slice %115 {offsets = [0, 64], sizes = [8, 64], strides = [1, 1]} : vector<8x192xf32> to vector<8x64xf32>
    %118 = vector.extract_strided_slice %115 {offsets = [0, 128], sizes = [8, 64], strides = [1, 1]} : vector<8x192xf32> to vector<8x64xf32>
    %119 = vector.extract_strided_slice %109 {offsets = [0, 192], sizes = [8, 64], strides = [1, 1]} : vector<8x256xf32> to vector<8x64xf32>
    %120 = math.tanh %119 : vector<8x64xf32>
    %121 = arith.mulf %117, %100 : vector<8x64xf32>
    %122 = arith.mulf %116, %120 : vector<8x64xf32>
    %123 = arith.addf %121, %122 : vector<8x64xf32>
    %124 = math.tanh %123 : vector<8x64xf32>
    %125 = arith.mulf %118, %124 : vector<8x64xf32>
    %c32_52 = arith.constant 32 : index
    %c0_53 = arith.constant 0 : index
    %126 = vector.load %arg12[%c32_52, %c0_53] : memref<64x64xf32, #tpu.memory_space<vmem>>, vector<8x64xf32>
    tpu.vector_store %arg12[%c32_52, %c0_53], %125 {strides = array<i32>} : memref<64x64xf32, #tpu.memory_space<vmem>>, vector<8x64xf32>,
    %c40_54 = arith.constant 40 : index
    %c0_55 = arith.constant 0 : index
    %127 = vector.load %arg13[%c40_54, %c0_55] : memref<64x256xf32, #tpu.memory_space<vmem>>, vector<8x256xf32>
    %c16_56 = arith.constant 16 : index
    %c0_57 = arith.constant 0 : index
    %128 = vector.load %arg14[%c16_56, %c0_57] : memref<64x256xf32, #tpu.memory_space<vmem>>, vector<8x256xf32>
    %129 = arith.addf %127, %128 : vector<8x256xf32>
    %c0_58 = arith.constant 0 : index
    %c0_59 = arith.constant 0 : index
    %130 = vector.load %arg3[%c0_58, %c0_59] : memref<64x256xf32, #tpu.memory_space<vmem>>, vector<64x256xf32>
    %cst_60 = arith.constant dense<0.000000e+00> : vector<8x256xf32>
    %131 = tpu.matmul %125, %130, %cst_60 {dimension_numbers = #tpu.dot_dimension_numbers<[1], [0], [0], [1], [0, 0, 1, 1], [], []>} : vector<8x64xf32>, vector<64x256xf32>, vector<8x256xf32> -> vector<8x256xf32>
    %132 = arith.addf %129, %131 : vector<8x256xf32>
    %133 = vector.extract_strided_slice %132 {offsets = [0, 0], sizes = [8, 192], strides = [1, 1]} : vector<8x256xf32> to vector<8x192xf32>
    %134 = arith.negf %133 : vector<8x192xf32>
    %135 = math.exp %134 : vector<8x192xf32>
    %cst_61 = arith.constant 1.000000e+00 : f32
    %136 = vector.broadcast %cst_61 : f32 to vector<8x192xf32>
    %137 = arith.addf %136, %135 : vector<8x192xf32>
    %138 = arith.divf %136, %137 : vector<8x192xf32>
    %139 = vector.extract_strided_slice %138 {offsets = [0, 0], sizes = [8, 64], strides = [1, 1]} : vector<8x192xf32> to vector<8x64xf32>
    %140 = vector.extract_strided_slice %138 {offsets = [0, 64], sizes = [8, 64], strides = [1, 1]} : vector<8x192xf32> to vector<8x64xf32>
    %141 = vector.extract_strided_slice %138 {offsets = [0, 128], sizes = [8, 64], strides = [1, 1]} : vector<8x192xf32> to vector<8x64xf32>
    %142 = vector.extract_strided_slice %132 {offsets = [0, 192], sizes = [8, 64], strides = [1, 1]} : vector<8x256xf32> to vector<8x64xf32>
    %143 = math.tanh %142 : vector<8x64xf32>
    %144 = arith.mulf %140, %123 : vector<8x64xf32>
    %145 = arith.mulf %139, %143 : vector<8x64xf32>
    %146 = arith.addf %144, %145 : vector<8x64xf32>
    %147 = math.tanh %146 : vector<8x64xf32>
    %148 = arith.mulf %141, %147 : vector<8x64xf32>
    %c40_62 = arith.constant 40 : index
    %c0_63 = arith.constant 0 : index
    %149 = vector.load %arg12[%c40_62, %c0_63] : memref<64x64xf32, #tpu.memory_space<vmem>>, vector<8x64xf32>
    tpu.vector_store %arg12[%c40_62, %c0_63], %148 {strides = array<i32>} : memref<64x64xf32, #tpu.memory_space<vmem>>, vector<8x64xf32>,
    %c48_64 = arith.constant 48 : index
    %c0_65 = arith.constant 0 : index
    %150 = vector.load %arg13[%c48_64, %c0_65] : memref<64x256xf32, #tpu.memory_space<vmem>>, vector<8x256xf32>
    %c8_66 = arith.constant 8 : index
    %c0_67 = arith.constant 0 : index
    %151 = vector.load %arg14[%c8_66, %c0_67] : memref<64x256xf32, #tpu.memory_space<vmem>>, vector<8x256xf32>
    %152 = arith.addf %150, %151 : vector<8x256xf32>
    %c0_68 = arith.constant 0 : index
    %c0_69 = arith.constant 0 : index
    %153 = vector.load %arg3[%c0_68, %c0_69] : memref<64x256xf32, #tpu.memory_space<vmem>>, vector<64x256xf32>
    %cst_70 = arith.constant dense<0.000000e+00> : vector<8x256xf32>
    %154 = tpu.matmul %148, %153, %cst_70 {dimension_numbers = #tpu.dot_dimension_numbers<[1], [0], [0], [1], [0, 0, 1, 1], [], []>} : vector<8x64xf32>, vector<64x256xf32>, vector<8x256xf32> -> vector<8x256xf32>
    %155 = arith.addf %152, %154 : vector<8x256xf32>
    %156 = vector.extract_strided_slice %155 {offsets = [0, 0], sizes = [8, 192], strides = [1, 1]} : vector<8x256xf32> to vector<8x192xf32>
    %157 = arith.negf %156 : vector<8x192xf32>
    %158 = math.exp %157 : vector<8x192xf32>
    %cst_71 = arith.constant 1.000000e+00 : f32
    %159 = vector.broadcast %cst_71 : f32 to vector<8x192xf32>
    %160 = arith.addf %159, %158 : vector<8x192xf32>
    %161 = arith.divf %159, %160 : vector<8x192xf32>
    %162 = vector.extract_strided_slice %161 {offsets = [0, 0], sizes = [8, 64], strides = [1, 1]} : vector<8x192xf32> to vector<8x64xf32>
    %163 = vector.extract_strided_slice %161 {offsets = [0, 64], sizes = [8, 64], strides = [1, 1]} : vector<8x192xf32> to vector<8x64xf32>
    %164 = vector.extract_strided_slice %161 {offsets = [0, 128], sizes = [8, 64], strides = [1, 1]} : vector<8x192xf32> to vector<8x64xf32>
    %165 = vector.extract_strided_slice %155 {offsets = [0, 192], sizes = [8, 64], strides = [1, 1]} : vector<8x256xf32> to vector<8x64xf32>
    %166 = math.tanh %165 : vector<8x64xf32>
    %167 = arith.mulf %163, %146 : vector<8x64xf32>
    %168 = arith.mulf %162, %166 : vector<8x64xf32>
    %169 = arith.addf %167, %168 : vector<8x64xf32>
    %170 = math.tanh %169 : vector<8x64xf32>
    %171 = arith.mulf %164, %170 : vector<8x64xf32>
    %c48_72 = arith.constant 48 : index
    %c0_73 = arith.constant 0 : index
    %172 = vector.load %arg12[%c48_72, %c0_73] : memref<64x64xf32, #tpu.memory_space<vmem>>, vector<8x64xf32>
    tpu.vector_store %arg12[%c48_72, %c0_73], %171 {strides = array<i32>} : memref<64x64xf32, #tpu.memory_space<vmem>>, vector<8x64xf32>,
    %c56_74 = arith.constant 56 : index
    %c0_75 = arith.constant 0 : index
    %173 = vector.load %arg13[%c56_74, %c0_75] : memref<64x256xf32, #tpu.memory_space<vmem>>, vector<8x256xf32>
    %c0_76 = arith.constant 0 : index
    %c0_77 = arith.constant 0 : index
    %174 = vector.load %arg14[%c0_76, %c0_77] : memref<64x256xf32, #tpu.memory_space<vmem>>, vector<8x256xf32>
    %175 = arith.addf %173, %174 : vector<8x256xf32>
    %c0_78 = arith.constant 0 : index
    %c0_79 = arith.constant 0 : index
    %176 = vector.load %arg3[%c0_78, %c0_79] : memref<64x256xf32, #tpu.memory_space<vmem>>, vector<64x256xf32>
    %cst_80 = arith.constant dense<0.000000e+00> : vector<8x256xf32>
    %177 = tpu.matmul %171, %176, %cst_80 {dimension_numbers = #tpu.dot_dimension_numbers<[1], [0], [0], [1], [0, 0, 1, 1], [], []>} : vector<8x64xf32>, vector<64x256xf32>, vector<8x256xf32> -> vector<8x256xf32>
    %178 = arith.addf %175, %177 : vector<8x256xf32>
    %179 = vector.extract_strided_slice %178 {offsets = [0, 0], sizes = [8, 192], strides = [1, 1]} : vector<8x256xf32> to vector<8x192xf32>
    %180 = arith.negf %179 : vector<8x192xf32>
    %181 = math.exp %180 : vector<8x192xf32>
    %cst_81 = arith.constant 1.000000e+00 : f32
    %182 = vector.broadcast %cst_81 : f32 to vector<8x192xf32>
    %183 = arith.addf %182, %181 : vector<8x192xf32>
    %184 = arith.divf %182, %183 : vector<8x192xf32>
    %185 = vector.extract_strided_slice %184 {offsets = [0, 0], sizes = [8, 64], strides = [1, 1]} : vector<8x192xf32> to vector<8x64xf32>
    %186 = vector.extract_strided_slice %184 {offsets = [0, 64], sizes = [8, 64], strides = [1, 1]} : vector<8x192xf32> to vector<8x64xf32>
    %187 = vector.extract_strided_slice %184 {offsets = [0, 128], sizes = [8, 64], strides = [1, 1]} : vector<8x192xf32> to vector<8x64xf32>
    %188 = vector.extract_strided_slice %178 {offsets = [0, 192], sizes = [8, 64], strides = [1, 1]} : vector<8x256xf32> to vector<8x64xf32>
    %189 = math.tanh %188 : vector<8x64xf32>
    %190 = arith.mulf %186, %169 : vector<8x64xf32>
    %191 = arith.mulf %185, %189 : vector<8x64xf32>
    %192 = arith.addf %190, %191 : vector<8x64xf32>
    %193 = math.tanh %192 : vector<8x64xf32>
    %194 = arith.mulf %187, %193 : vector<8x64xf32>
    %c56_82 = arith.constant 56 : index
    %c0_83 = arith.constant 0 : index
    %195 = vector.load %arg12[%c56_82, %c0_83] : memref<64x64xf32, #tpu.memory_space<vmem>>, vector<8x64xf32>
    tpu.vector_store %arg12[%c56_82, %c0_83], %194 {strides = array<i32>} : memref<64x64xf32, #tpu.memory_space<vmem>>, vector<8x64xf32>,
    %c0_84 = arith.constant 0 : index
    %c0_85 = arith.constant 0 : index
    %196 = vector.load %arg12[%c0_84, %c0_85] : memref<64x64xf32, #tpu.memory_space<vmem>>, vector<64x64xf32>
    %c0_86 = arith.constant 0 : index
    %c0_87 = arith.constant 0 : index
    %197 = vector.load %arg4[%c0_86, %c0_87] : memref<64x512xf32, #tpu.memory_space<vmem>>, vector<64x512xf32>
    %cst_88 = arith.constant dense<0.000000e+00> : vector<64x512xf32>
    %198 = tpu.matmul %196, %197, %cst_88 {dimension_numbers = #tpu.dot_dimension_numbers<[1], [0], [0], [1], [0, 0, 1, 1], [], []>} : vector<64x64xf32>, vector<64x512xf32>, vector<64x512xf32> -> vector<64x512xf32>
    %199 = vector.extract_strided_slice %198 {offsets = [0, 0], sizes = [64, 256], strides = [1, 1]} : vector<64x512xf32> to vector<64x256xf32>
    %c0_89 = arith.constant 0 : index
    %c0_90 = arith.constant 0 : index
    %200 = vector.load %arg5[%c0_89, %c0_90] : memref<1x256xf32, #tpu.memory_space<vmem>>, vector<1x256xf32>
    %201 = vector.broadcast %200 : vector<1x256xf32> to vector<64x256xf32>
    %202 = arith.addf %199, %201 : vector<64x256xf32>
    %c0_91 = arith.constant 0 : index
    %c0_92 = arith.constant 0 : index
    %203 = vector.load %arg13[%c0_91, %c0_92] : memref<64x256xf32, #tpu.memory_space<vmem>>, vector<64x256xf32>
    tpu.vector_store %arg13[%c0_91, %c0_92], %202 {strides = array<i32>} : memref<64x256xf32, #tpu.memory_space<vmem>>, vector<64x256xf32>,
    %204 = vector.extract_strided_slice %198 {offsets = [0, 256], sizes = [64, 256], strides = [1, 1]} : vector<64x512xf32> to vector<64x256xf32>
    %c0_93 = arith.constant 0 : index
    %c0_94 = arith.constant 0 : index
    %205 = vector.load %arg14[%c0_93, %c0_94] : memref<64x256xf32, #tpu.memory_space<vmem>>, vector<64x256xf32>
    tpu.vector_store %arg14[%c0_93, %c0_94], %204 {strides = array<i32>} : memref<64x256xf32, #tpu.memory_space<vmem>>, vector<64x256xf32>,
    %cst_95 = arith.constant 0.000000e+00 : f32
    %206 = vector.broadcast %cst_95 : f32 to vector<8x64xf32>
    %cst_96 = arith.constant 0.000000e+00 : f32
    %207 = vector.broadcast %cst_96 : f32 to vector<8x64xf32>
    %c0_97 = arith.constant 0 : index
    %c0_98 = arith.constant 0 : index
    %208 = vector.load %arg13[%c0_97, %c0_98] : memref<64x256xf32, #tpu.memory_space<vmem>>, vector<8x256xf32>
    %c56_99 = arith.constant 56 : index
    %c0_100 = arith.constant 0 : index
    %209 = vector.load %arg14[%c56_99, %c0_100] : memref<64x256xf32, #tpu.memory_space<vmem>>, vector<8x256xf32>
    %210 = arith.addf %208, %209 : vector<8x256xf32>
    %c0_101 = arith.constant 0 : index
    %c0_102 = arith.constant 0 : index
    %211 = vector.load %arg6[%c0_101, %c0_102] : memref<64x256xf32, #tpu.memory_space<vmem>>, vector<64x256xf32>
    %cst_103 = arith.constant dense<0.000000e+00> : vector<8x256xf32>
    %212 = tpu.matmul %206, %211, %cst_103 {dimension_numbers = #tpu.dot_dimension_numbers<[1], [0], [0], [1], [0, 0, 1, 1], [], []>} : vector<8x64xf32>, vector<64x256xf32>, vector<8x256xf32> -> vector<8x256xf32>
    %213 = arith.addf %210, %212 : vector<8x256xf32>
    %214 = vector.extract_strided_slice %213 {offsets = [0, 0], sizes = [8, 192], strides = [1, 1]} : vector<8x256xf32> to vector<8x192xf32>
    %215 = arith.negf %214 : vector<8x192xf32>
    %216 = math.exp %215 : vector<8x192xf32>
    %cst_104 = arith.constant 1.000000e+00 : f32
    %217 = vector.broadcast %cst_104 : f32 to vector<8x192xf32>
    %218 = arith.addf %217, %216 : vector<8x192xf32>
    %219 = arith.divf %217, %218 : vector<8x192xf32>
    %220 = vector.extract_strided_slice %219 {offsets = [0, 0], sizes = [8, 64], strides = [1, 1]} : vector<8x192xf32> to vector<8x64xf32>
    %221 = vector.extract_strided_slice %219 {offsets = [0, 64], sizes = [8, 64], strides = [1, 1]} : vector<8x192xf32> to vector<8x64xf32>
    %222 = vector.extract_strided_slice %219 {offsets = [0, 128], sizes = [8, 64], strides = [1, 1]} : vector<8x192xf32> to vector<8x64xf32>
    %223 = vector.extract_strided_slice %213 {offsets = [0, 192], sizes = [8, 64], strides = [1, 1]} : vector<8x256xf32> to vector<8x64xf32>
    %224 = math.tanh %223 : vector<8x64xf32>
    %225 = arith.mulf %221, %207 : vector<8x64xf32>
    %226 = arith.mulf %220, %224 : vector<8x64xf32>
    %227 = arith.addf %225, %226 : vector<8x64xf32>
    %228 = math.tanh %227 : vector<8x64xf32>
    %229 = arith.mulf %222, %228 : vector<8x64xf32>
    %c8_105 = arith.constant 8 : index
    %c0_106 = arith.constant 0 : index
    %230 = vector.load %arg13[%c8_105, %c0_106] : memref<64x256xf32, #tpu.memory_space<vmem>>, vector<8x256xf32>
    %c48_107 = arith.constant 48 : index
    %c0_108 = arith.constant 0 : index
    %231 = vector.load %arg14[%c48_107, %c0_108] : memref<64x256xf32, #tpu.memory_space<vmem>>, vector<8x256xf32>
    %232 = arith.addf %230, %231 : vector<8x256xf32>
    %c0_109 = arith.constant 0 : index
    %c0_110 = arith.constant 0 : index
    %233 = vector.load %arg6[%c0_109, %c0_110] : memref<64x256xf32, #tpu.memory_space<vmem>>, vector<64x256xf32>
    %cst_111 = arith.constant dense<0.000000e+00> : vector<8x256xf32>
    %234 = tpu.matmul %229, %233, %cst_111 {dimension_numbers = #tpu.dot_dimension_numbers<[1], [0], [0], [1], [0, 0, 1, 1], [], []>} : vector<8x64xf32>, vector<64x256xf32>, vector<8x256xf32> -> vector<8x256xf32>
    %235 = arith.addf %232, %234 : vector<8x256xf32>
    %236 = vector.extract_strided_slice %235 {offsets = [0, 0], sizes = [8, 192], strides = [1, 1]} : vector<8x256xf32> to vector<8x192xf32>
    %237 = arith.negf %236 : vector<8x192xf32>
    %238 = math.exp %237 : vector<8x192xf32>
    %cst_112 = arith.constant 1.000000e+00 : f32
    %239 = vector.broadcast %cst_112 : f32 to vector<8x192xf32>
    %240 = arith.addf %239, %238 : vector<8x192xf32>
    %241 = arith.divf %239, %240 : vector<8x192xf32>
    %242 = vector.extract_strided_slice %241 {offsets = [0, 0], sizes = [8, 64], strides = [1, 1]} : vector<8x192xf32> to vector<8x64xf32>
    %243 = vector.extract_strided_slice %241 {offsets = [0, 64], sizes = [8, 64], strides = [1, 1]} : vector<8x192xf32> to vector<8x64xf32>
    %244 = vector.extract_strided_slice %241 {offsets = [0, 128], sizes = [8, 64], strides = [1, 1]} : vector<8x192xf32> to vector<8x64xf32>
    %245 = vector.extract_strided_slice %235 {offsets = [0, 192], sizes = [8, 64], strides = [1, 1]} : vector<8x256xf32> to vector<8x64xf32>
    %246 = math.tanh %245 : vector<8x64xf32>
    %247 = arith.mulf %243, %227 : vector<8x64xf32>
    %248 = arith.mulf %242, %246 : vector<8x64xf32>
    %249 = arith.addf %247, %248 : vector<8x64xf32>
    %250 = math.tanh %249 : vector<8x64xf32>
    %251 = arith.mulf %244, %250 : vector<8x64xf32>
    %c16_113 = arith.constant 16 : index
    %c0_114 = arith.constant 0 : index
    %252 = vector.load %arg13[%c16_113, %c0_114] : memref<64x256xf32, #tpu.memory_space<vmem>>, vector<8x256xf32>
    %c40_115 = arith.constant 40 : index
    %c0_116 = arith.constant 0 : index
    %253 = vector.load %arg14[%c40_115, %c0_116] : memref<64x256xf32, #tpu.memory_space<vmem>>, vector<8x256xf32>
    %254 = arith.addf %252, %253 : vector<8x256xf32>
    %c0_117 = arith.constant 0 : index
    %c0_118 = arith.constant 0 : index
    %255 = vector.load %arg6[%c0_117, %c0_118] : memref<64x256xf32, #tpu.memory_space<vmem>>, vector<64x256xf32>
    %cst_119 = arith.constant dense<0.000000e+00> : vector<8x256xf32>
    %256 = tpu.matmul %251, %255, %cst_119 {dimension_numbers = #tpu.dot_dimension_numbers<[1], [0], [0], [1], [0, 0, 1, 1], [], []>} : vector<8x64xf32>, vector<64x256xf32>, vector<8x256xf32> -> vector<8x256xf32>
    %257 = arith.addf %254, %256 : vector<8x256xf32>
    %258 = vector.extract_strided_slice %257 {offsets = [0, 0], sizes = [8, 192], strides = [1, 1]} : vector<8x256xf32> to vector<8x192xf32>
    %259 = arith.negf %258 : vector<8x192xf32>
    %260 = math.exp %259 : vector<8x192xf32>
    %cst_120 = arith.constant 1.000000e+00 : f32
    %261 = vector.broadcast %cst_120 : f32 to vector<8x192xf32>
    %262 = arith.addf %261, %260 : vector<8x192xf32>
    %263 = arith.divf %261, %262 : vector<8x192xf32>
    %264 = vector.extract_strided_slice %263 {offsets = [0, 0], sizes = [8, 64], strides = [1, 1]} : vector<8x192xf32> to vector<8x64xf32>
    %265 = vector.extract_strided_slice %263 {offsets = [0, 64], sizes = [8, 64], strides = [1, 1]} : vector<8x192xf32> to vector<8x64xf32>
    %266 = vector.extract_strided_slice %263 {offsets = [0, 128], sizes = [8, 64], strides = [1, 1]} : vector<8x192xf32> to vector<8x64xf32>
    %267 = vector.extract_strided_slice %257 {offsets = [0, 192], sizes = [8, 64], strides = [1, 1]} : vector<8x256xf32> to vector<8x64xf32>
    %268 = math.tanh %267 : vector<8x64xf32>
    %269 = arith.mulf %265, %249 : vector<8x64xf32>
    %270 = arith.mulf %264, %268 : vector<8x64xf32>
    %271 = arith.addf %269, %270 : vector<8x64xf32>
    %272 = math.tanh %271 : vector<8x64xf32>
    %273 = arith.mulf %266, %272 : vector<8x64xf32>
    %c24_121 = arith.constant 24 : index
    %c0_122 = arith.constant 0 : index
    %274 = vector.load %arg13[%c24_121, %c0_122] : memref<64x256xf32, #tpu.memory_space<vmem>>, vector<8x256xf32>
    %c32_123 = arith.constant 32 : index
    %c0_124 = arith.constant 0 : index
    %275 = vector.load %arg14[%c32_123, %c0_124] : memref<64x256xf32, #tpu.memory_space<vmem>>, vector<8x256xf32>
    %276 = arith.addf %274, %275 : vector<8x256xf32>
    %c0_125 = arith.constant 0 : index
    %c0_126 = arith.constant 0 : index
    %277 = vector.load %arg6[%c0_125, %c0_126] : memref<64x256xf32, #tpu.memory_space<vmem>>, vector<64x256xf32>
    %cst_127 = arith.constant dense<0.000000e+00> : vector<8x256xf32>
    %278 = tpu.matmul %273, %277, %cst_127 {dimension_numbers = #tpu.dot_dimension_numbers<[1], [0], [0], [1], [0, 0, 1, 1], [], []>} : vector<8x64xf32>, vector<64x256xf32>, vector<8x256xf32> -> vector<8x256xf32>
    %279 = arith.addf %276, %278 : vector<8x256xf32>
    %280 = vector.extract_strided_slice %279 {offsets = [0, 0], sizes = [8, 192], strides = [1, 1]} : vector<8x256xf32> to vector<8x192xf32>
    %281 = arith.negf %280 : vector<8x192xf32>
    %282 = math.exp %281 : vector<8x192xf32>
    %cst_128 = arith.constant 1.000000e+00 : f32
    %283 = vector.broadcast %cst_128 : f32 to vector<8x192xf32>
    %284 = arith.addf %283, %282 : vector<8x192xf32>
    %285 = arith.divf %283, %284 : vector<8x192xf32>
    %286 = vector.extract_strided_slice %285 {offsets = [0, 0], sizes = [8, 64], strides = [1, 1]} : vector<8x192xf32> to vector<8x64xf32>
    %287 = vector.extract_strided_slice %285 {offsets = [0, 64], sizes = [8, 64], strides = [1, 1]} : vector<8x192xf32> to vector<8x64xf32>
    %288 = vector.extract_strided_slice %285 {offsets = [0, 128], sizes = [8, 64], strides = [1, 1]} : vector<8x192xf32> to vector<8x64xf32>
    %289 = vector.extract_strided_slice %279 {offsets = [0, 192], sizes = [8, 64], strides = [1, 1]} : vector<8x256xf32> to vector<8x64xf32>
    %290 = math.tanh %289 : vector<8x64xf32>
    %291 = arith.mulf %287, %271 : vector<8x64xf32>
    %292 = arith.mulf %286, %290 : vector<8x64xf32>
    %293 = arith.addf %291, %292 : vector<8x64xf32>
    %294 = math.tanh %293 : vector<8x64xf32>
    %295 = arith.mulf %288, %294 : vector<8x64xf32>
    %c32_129 = arith.constant 32 : index
    %c0_130 = arith.constant 0 : index
    %296 = vector.load %arg13[%c32_129, %c0_130] : memref<64x256xf32, #tpu.memory_space<vmem>>, vector<8x256xf32>
    %c24_131 = arith.constant 24 : index
    %c0_132 = arith.constant 0 : index
    %297 = vector.load %arg14[%c24_131, %c0_132] : memref<64x256xf32, #tpu.memory_space<vmem>>, vector<8x256xf32>
    %298 = arith.addf %296, %297 : vector<8x256xf32>
    %c0_133 = arith.constant 0 : index
    %c0_134 = arith.constant 0 : index
    %299 = vector.load %arg6[%c0_133, %c0_134] : memref<64x256xf32, #tpu.memory_space<vmem>>, vector<64x256xf32>
    %cst_135 = arith.constant dense<0.000000e+00> : vector<8x256xf32>
    %300 = tpu.matmul %295, %299, %cst_135 {dimension_numbers = #tpu.dot_dimension_numbers<[1], [0], [0], [1], [0, 0, 1, 1], [], []>} : vector<8x64xf32>, vector<64x256xf32>, vector<8x256xf32> -> vector<8x256xf32>
    %301 = arith.addf %298, %300 : vector<8x256xf32>
    %302 = vector.extract_strided_slice %301 {offsets = [0, 0], sizes = [8, 192], strides = [1, 1]} : vector<8x256xf32> to vector<8x192xf32>
    %303 = arith.negf %302 : vector<8x192xf32>
    %304 = math.exp %303 : vector<8x192xf32>
    %cst_136 = arith.constant 1.000000e+00 : f32
    %305 = vector.broadcast %cst_136 : f32 to vector<8x192xf32>
    %306 = arith.addf %305, %304 : vector<8x192xf32>
    %307 = arith.divf %305, %306 : vector<8x192xf32>
    %308 = vector.extract_strided_slice %307 {offsets = [0, 0], sizes = [8, 64], strides = [1, 1]} : vector<8x192xf32> to vector<8x64xf32>
    %309 = vector.extract_strided_slice %307 {offsets = [0, 64], sizes = [8, 64], strides = [1, 1]} : vector<8x192xf32> to vector<8x64xf32>
    %310 = vector.extract_strided_slice %307 {offsets = [0, 128], sizes = [8, 64], strides = [1, 1]} : vector<8x192xf32> to vector<8x64xf32>
    %311 = vector.extract_strided_slice %301 {offsets = [0, 192], sizes = [8, 64], strides = [1, 1]} : vector<8x256xf32> to vector<8x64xf32>
    %312 = math.tanh %311 : vector<8x64xf32>
    %313 = arith.mulf %309, %293 : vector<8x64xf32>
    %314 = arith.mulf %308, %312 : vector<8x64xf32>
    %315 = arith.addf %313, %314 : vector<8x64xf32>
    %316 = math.tanh %315 : vector<8x64xf32>
    %317 = arith.mulf %310, %316 : vector<8x64xf32>
    %c40_137 = arith.constant 40 : index
    %c0_138 = arith.constant 0 : index
    %318 = vector.load %arg13[%c40_137, %c0_138] : memref<64x256xf32, #tpu.memory_space<vmem>>, vector<8x256xf32>
    %c16_139 = arith.constant 16 : index
    %c0_140 = arith.constant 0 : index
    %319 = vector.load %arg14[%c16_139, %c0_140] : memref<64x256xf32, #tpu.memory_space<vmem>>, vector<8x256xf32>
    %320 = arith.addf %318, %319 : vector<8x256xf32>
    %c0_141 = arith.constant 0 : index
    %c0_142 = arith.constant 0 : index
    %321 = vector.load %arg6[%c0_141, %c0_142] : memref<64x256xf32, #tpu.memory_space<vmem>>, vector<64x256xf32>
    %cst_143 = arith.constant dense<0.000000e+00> : vector<8x256xf32>
    %322 = tpu.matmul %317, %321, %cst_143 {dimension_numbers = #tpu.dot_dimension_numbers<[1], [0], [0], [1], [0, 0, 1, 1], [], []>} : vector<8x64xf32>, vector<64x256xf32>, vector<8x256xf32> -> vector<8x256xf32>
    %323 = arith.addf %320, %322 : vector<8x256xf32>
    %324 = vector.extract_strided_slice %323 {offsets = [0, 0], sizes = [8, 192], strides = [1, 1]} : vector<8x256xf32> to vector<8x192xf32>
    %325 = arith.negf %324 : vector<8x192xf32>
    %326 = math.exp %325 : vector<8x192xf32>
    %cst_144 = arith.constant 1.000000e+00 : f32
    %327 = vector.broadcast %cst_144 : f32 to vector<8x192xf32>
    %328 = arith.addf %327, %326 : vector<8x192xf32>
    %329 = arith.divf %327, %328 : vector<8x192xf32>
    %330 = vector.extract_strided_slice %329 {offsets = [0, 0], sizes = [8, 64], strides = [1, 1]} : vector<8x192xf32> to vector<8x64xf32>
    %331 = vector.extract_strided_slice %329 {offsets = [0, 64], sizes = [8, 64], strides = [1, 1]} : vector<8x192xf32> to vector<8x64xf32>
    %332 = vector.extract_strided_slice %329 {offsets = [0, 128], sizes = [8, 64], strides = [1, 1]} : vector<8x192xf32> to vector<8x64xf32>
    %333 = vector.extract_strided_slice %323 {offsets = [0, 192], sizes = [8, 64], strides = [1, 1]} : vector<8x256xf32> to vector<8x64xf32>
    %334 = math.tanh %333 : vector<8x64xf32>
    %335 = arith.mulf %331, %315 : vector<8x64xf32>
    %336 = arith.mulf %330, %334 : vector<8x64xf32>
    %337 = arith.addf %335, %336 : vector<8x64xf32>
    %338 = math.tanh %337 : vector<8x64xf32>
    %339 = arith.mulf %332, %338 : vector<8x64xf32>
    %c48_145 = arith.constant 48 : index
    %c0_146 = arith.constant 0 : index
    %340 = vector.load %arg13[%c48_145, %c0_146] : memref<64x256xf32, #tpu.memory_space<vmem>>, vector<8x256xf32>
    %c8_147 = arith.constant 8 : index
    %c0_148 = arith.constant 0 : index
    %341 = vector.load %arg14[%c8_147, %c0_148] : memref<64x256xf32, #tpu.memory_space<vmem>>, vector<8x256xf32>
    %342 = arith.addf %340, %341 : vector<8x256xf32>
    %c0_149 = arith.constant 0 : index
    %c0_150 = arith.constant 0 : index
    %343 = vector.load %arg6[%c0_149, %c0_150] : memref<64x256xf32, #tpu.memory_space<vmem>>, vector<64x256xf32>
    %cst_151 = arith.constant dense<0.000000e+00> : vector<8x256xf32>
    %344 = tpu.matmul %339, %343, %cst_151 {dimension_numbers = #tpu.dot_dimension_numbers<[1], [0], [0], [1], [0, 0, 1, 1], [], []>} : vector<8x64xf32>, vector<64x256xf32>, vector<8x256xf32> -> vector<8x256xf32>
    %345 = arith.addf %342, %344 : vector<8x256xf32>
    %346 = vector.extract_strided_slice %345 {offsets = [0, 0], sizes = [8, 192], strides = [1, 1]} : vector<8x256xf32> to vector<8x192xf32>
    %347 = arith.negf %346 : vector<8x192xf32>
    %348 = math.exp %347 : vector<8x192xf32>
    %cst_152 = arith.constant 1.000000e+00 : f32
    %349 = vector.broadcast %cst_152 : f32 to vector<8x192xf32>
    %350 = arith.addf %349, %348 : vector<8x192xf32>
    %351 = arith.divf %349, %350 : vector<8x192xf32>
    %352 = vector.extract_strided_slice %351 {offsets = [0, 0], sizes = [8, 64], strides = [1, 1]} : vector<8x192xf32> to vector<8x64xf32>
    %353 = vector.extract_strided_slice %351 {offsets = [0, 64], sizes = [8, 64], strides = [1, 1]} : vector<8x192xf32> to vector<8x64xf32>
    %354 = vector.extract_strided_slice %351 {offsets = [0, 128], sizes = [8, 64], strides = [1, 1]} : vector<8x192xf32> to vector<8x64xf32>
    %355 = vector.extract_strided_slice %345 {offsets = [0, 192], sizes = [8, 64], strides = [1, 1]} : vector<8x256xf32> to vector<8x64xf32>
    %356 = math.tanh %355 : vector<8x64xf32>
    %357 = arith.mulf %353, %337 : vector<8x64xf32>
    %358 = arith.mulf %352, %356 : vector<8x64xf32>
    %359 = arith.addf %357, %358 : vector<8x64xf32>
    %360 = math.tanh %359 : vector<8x64xf32>
    %361 = arith.mulf %354, %360 : vector<8x64xf32>
    %c56_153 = arith.constant 56 : index
    %c0_154 = arith.constant 0 : index
    %362 = vector.load %arg13[%c56_153, %c0_154] : memref<64x256xf32, #tpu.memory_space<vmem>>, vector<8x256xf32>
    %c0_155 = arith.constant 0 : index
    %c0_156 = arith.constant 0 : index
    %363 = vector.load %arg14[%c0_155, %c0_156] : memref<64x256xf32, #tpu.memory_space<vmem>>, vector<8x256xf32>
    %364 = arith.addf %362, %363 : vector<8x256xf32>
    %c0_157 = arith.constant 0 : index
    %c0_158 = arith.constant 0 : index
    %365 = vector.load %arg6[%c0_157, %c0_158] : memref<64x256xf32, #tpu.memory_space<vmem>>, vector<64x256xf32>
    %cst_159 = arith.constant dense<0.000000e+00> : vector<8x256xf32>
    %366 = tpu.matmul %361, %365, %cst_159 {dimension_numbers = #tpu.dot_dimension_numbers<[1], [0], [0], [1], [0, 0, 1, 1], [], []>} : vector<8x64xf32>, vector<64x256xf32>, vector<8x256xf32> -> vector<8x256xf32>
    %367 = arith.addf %364, %366 : vector<8x256xf32>
    %368 = vector.extract_strided_slice %367 {offsets = [0, 0], sizes = [8, 192], strides = [1, 1]} : vector<8x256xf32> to vector<8x192xf32>
    %369 = arith.negf %368 : vector<8x192xf32>
    %370 = math.exp %369 : vector<8x192xf32>
    %cst_160 = arith.constant 1.000000e+00 : f32
    %371 = vector.broadcast %cst_160 : f32 to vector<8x192xf32>
    %372 = arith.addf %371, %370 : vector<8x192xf32>
    %373 = arith.divf %371, %372 : vector<8x192xf32>
    %374 = vector.extract_strided_slice %373 {offsets = [0, 0], sizes = [8, 64], strides = [1, 1]} : vector<8x192xf32> to vector<8x64xf32>
    %375 = vector.extract_strided_slice %373 {offsets = [0, 64], sizes = [8, 64], strides = [1, 1]} : vector<8x192xf32> to vector<8x64xf32>
    %376 = vector.extract_strided_slice %373 {offsets = [0, 128], sizes = [8, 64], strides = [1, 1]} : vector<8x192xf32> to vector<8x64xf32>
    %377 = vector.extract_strided_slice %367 {offsets = [0, 192], sizes = [8, 64], strides = [1, 1]} : vector<8x256xf32> to vector<8x64xf32>
    %378 = math.tanh %377 : vector<8x64xf32>
    %379 = arith.mulf %375, %359 : vector<8x64xf32>
    %380 = arith.mulf %374, %378 : vector<8x64xf32>
    %381 = arith.addf %379, %380 : vector<8x64xf32>
    %382 = math.tanh %381 : vector<8x64xf32>
    %383 = arith.mulf %376, %382 : vector<8x64xf32>
    %c0_161 = arith.constant 0 : index
    %c0_162 = arith.constant 0 : index
    %384 = vector.load %arg7[%c0_161, %c0_162] : memref<64x32xf32, #tpu.memory_space<vmem>>, vector<64x32xf32>
    %cst_163 = arith.constant dense<0.000000e+00> : vector<8x32xf32>
    %385 = tpu.matmul %383, %384, %cst_163 {dimension_numbers = #tpu.dot_dimension_numbers<[1], [0], [0], [1], [0, 0, 1, 1], [], []>} : vector<8x64xf32>, vector<64x32xf32>, vector<8x32xf32> -> vector<8x32xf32>
    %c0_164 = arith.constant 0 : index
    %c0_165 = arith.constant 0 : index
    %386 = vector.load %arg8[%c0_164, %c0_165] : memref<1x32xf32, #tpu.memory_space<vmem>>, vector<1x32xf32>
    %387 = vector.broadcast %386 : vector<1x32xf32> to vector<8x32xf32>
    %388 = arith.addf %385, %387 : vector<8x32xf32>
    %cst_166 = arith.constant 0.000000e+00 : f32
    %389 = vector.broadcast %cst_166 : f32 to vector<8x32xf32>
    %390 = arith.maximumf %388, %389 : vector<8x32xf32>
    tpu.wait_dma2 semaphore(%arg16 : memref<!tpu.dma_semaphore, #tpu.memory_space<semaphore_mem>>) src(%arg9 : memref<32x2816xf32, #tpu.memory_space<any>>) dst(%arg15 : memref<32x2816xf32, #tpu.memory_space<vmem>>)
    %c0_167 = arith.constant 0 : index
    %c0_168 = arith.constant 0 : index
    %391 = vector.load %arg15[%c0_167, %c0_168] : memref<32x2816xf32, #tpu.memory_space<vmem>>, vector<32x2816xf32>
    %cst_169 = arith.constant dense<0.000000e+00> : vector<8x2816xf32>
    %392 = tpu.matmul %390, %391, %cst_169 {dimension_numbers = #tpu.dot_dimension_numbers<[1], [0], [0], [1], [0, 0, 1, 1], [], []>} : vector<8x32xf32>, vector<32x2816xf32>, vector<8x2816xf32> -> vector<8x2816xf32>
    %c0_170 = arith.constant 0 : index
    %c0_171 = arith.constant 0 : index
    %393 = vector.load %arg10[%c0_170, %c0_171] : memref<1x2816xf32, #tpu.memory_space<vmem>>, vector<1x2816xf32>
    %394 = vector.broadcast %393 : vector<1x2816xf32> to vector<8x2816xf32>
    %395 = arith.addf %392, %394 : vector<8x2816xf32>
    %396 = vector.extract_strided_slice %395 {offsets = [0, 0], sizes = [2, 2816], strides = [1, 1]} : vector<8x2816xf32> to vector<2x2816xf32>
    %c0_172 = arith.constant 0 : index
    %c0_173 = arith.constant 0 : index
    %397 = vector.load %arg11[%c0_172, %c0_173] : memref<2x2816xf32, #tpu.memory_space<vmem>>, vector<2x2816xf32>
    tpu.vector_store %arg11[%c0_172, %c0_173], %396 {strides = array<i32>} : memref<2x2816xf32, #tpu.memory_space<vmem>>, vector<2x2816xf32>,
    return
  }
}

</mosaic_0001>

<bundles_post_ra>
// kernel: multinet_forward.1
= control target key start
LH: loop header
LB: loop body
LE: loop exit
PB: predicated region body
PF: predicated region fallthrough
CT: control target
= control target key end

     0   :  { %16 = vsyncpa [#allocation8], 0  ;;  %s5579_s0 = inlined_call_operand.vmem [shape: f32[64,2], index: 0, kind: input, shape index: {}]   ;;  %s5580_s1 = inlined_call_operand.vmem [shape: f32[2,512], index: 1, kind: input, shape index: {}]   ;;  %s5581_s2 = inlined_call_operand.vmem [shape: f32[1,256], index: 2, kind: input, shape index: {}]   ;;  %s5582_s3 = inlined_call_operand.vmem [shape: f32[64,256], index: 3, kind: input, shape index: {}]   ;;  %s5583_s4 = inlined_call_operand.hbm [shape: f32[64,512], index: 4, kind: input, shape index: {}]   ;;  %s5584_s5 = inlined_call_operand.vmem [shape: f32[1,256], index: 5, kind: input, shape index: {}]   ;;  %s5585_s6 = inlined_call_operand.hbm [shape: f32[64,256], index: 6, kind: input, shape index: {}]   ;;  %s5586_s7 = inlined_call_operand.vmem [shape: f32[64,32], index: 7, kind: input, shape index: {}]   ;;  %s5587_s8 = inlined_call_operand.vmem [shape: f32[1,32], index: 8, kind: input, shape index: {}]   ;;  %s5588_s9 = inlined_call_operand.hbm [shape: f32[32,2816], index: 9, kind: input, shape index: {}]   ;;  %s5589_s10 = inlined_call_operand.vmem [shape: f32[1,2816], index: 10, kind: input, shape index: {}]   ;;  %s5590_s11 = inlined_call_operand.hbm [shape: f32[2,2816], index: 11, kind: output, shape index: {}]  }
   0x1   :  { %17 = vsyncpa [#allocation11], 0 }
   0x2   :  { %18 = vsyncpa [#allocation9], 0  ;;  %s4858_s17 = smov [#allocation7]   ;;  %s4762_s21 = scalar_lea.hbm %s5583_s4, 4096 }
   0x3   :  { %s32_s18 = sshll.u32 %s4858_s17, 4  ;;  %p4763_p0 = scmp.ne.s32.totalorder %s5583_s4, %s4762_s21  ;;  %s33_s18 = int_to_ptr.vmem [resolvable:$true] %s32_s18 }
   0x4   :  { %p4766_p1 = scmp.lt.u32.totalorder %s4762_s21, %s5583_s4 }
   0x6   :  { %p4768_p2 = pnand %p4766_p1, %p4763_p0 }
   0x8   :  { %4771 = shalt.err (!%p4768_p2)
}
   0x9   :  { %s4772_s26 = scalar_lea.vmem %s33_s18, 4096  ;;  %p4777_p4 = scmp.lt.s32.totalorder %s33_s18, %s33_s18 }
   0xa   :  { %p4773_p3 = scmp.ne.s32.totalorder %s33_s18, %s4772_s26  ;;  %p4778_p5 = scmp.lt.s32.totalorder %s4772_s26, %s4772_s26 }
   0xc   :  { %p4779_p6 = por %p4778_p5, %p4777_p4 }
   0xe   :  { %p4780_p7 = pnand %p4779_p6, %p4773_p3 }
  0x10   :  { %4783 = shalt.err (!%p4780_p7)
}
  0x11   :  { %s4859_s27 = smov 512   ;;  %s4860_s28 = smov 32  }
  0x12   :  { %38 = dma.hbm_to_vmem [thread:$0]  %s5583_s4, 4096, %s33_s18, [#allocation8], %s4859_s27, %s4859_s27, %s4860_s28  }
  0x13   :  { %s4861_s12 = smov [#allocation10]   ;;  %s4784_s16 = scalar_lea.hbm %s5585_s6, 2048 }
  0x14   :  { %s46_s13 = sshll.u32 %s4861_s12, 4  ;;  %p4785_p8 = scmp.ne.s32.totalorder %s5585_s6, %s4784_s16  ;;  %s47_s13 = int_to_ptr.vmem [resolvable:$true] %s46_s13 }
  0x15   :  { %p4788_p9 = scmp.lt.u32.totalorder %s4784_s16, %s5585_s6 }
  0x17   :  { %p4790_p10 = pnand %p4788_p9, %p4785_p8 }
  0x19   :  { %4793 = shalt.err (!%p4790_p10)
}
  0x1a   :  { %s4794_s22 = scalar_lea.vmem %s47_s13, 2048  ;;  %p4799_p12 = scmp.lt.s32.totalorder %s47_s13, %s47_s13 }
  0x1b   :  { %p4795_p11 = scmp.ne.s32.totalorder %s47_s13, %s4794_s22  ;;  %p4800_p13 = scmp.lt.s32.totalorder %s4794_s22, %s4794_s22 }
  0x1d   :  { %p4801_p0 = por %p4800_p13, %p4799_p12 }
  0x1f   :  { %p4802_p1 = pnand %p4801_p0, %p4795_p11 }
  0x21   :  { %4805 = shalt.err (!%p4802_p1)
}
  0x22   :  { %s4862_s4 = smov 256   ;;  %s4863_s18 = smov 16  }
  0x23   :  { %52 = dma.hbm_to_vmem [thread:$0]  %s5585_s6, 2048, %s47_s13, [#allocation11], %s4862_s4, %s4862_s4, %s4863_s18  }
  0x24   :  { %4850 = dma.done.wait [#allocation8], 4096  }
  0x25   :  { %4851 = vsyncadd [#allocation8], 4294963200 }
  0x26   :  { %4852 = dma.done.wait [#allocation11], 2048  }
  0x27   :  { %4853 = vsyncadd [#allocation11], 4294965248  ;;  %v90_v0 = vlaneseq  ;;  %v4864_v1 = vmov 1983009808   ;;  %v4865_v3 = vmov 0.0   ;;  %v84_v8 = vld [vmem:[%s5580_s1] sm:$0xff] }
  0x28   :  { %v88_v2 = vunpack.c.l.s4 %v4864_v1  ;;  %201 = vmatprep.mubr.f32.mxu0 %v4865_v3  ;;  %1584 = vmatprep.mubr.f32.mxu1 %v4865_v3  ;;  %v4971_v9 = vld [vmem:[%s5581_s2] sm:$0x3]  ;;  %v86_v11 = vcombine.high %v84_v8, %v84_v8  ;;  %vm128_vm0 = vcmask 1041408   ;;  %v430_v17 = vld [vmem:[%s5582_s3 + $0x8] sm:$0xff]  ;;  %vm103_vm1 = vcmask 15360   ;;  %v432_v19 = vld [vmem:[%s5582_s3 + $0x18] sm:$0xff] }
  0x29   :  { %v4957_v4 = vshrl.u32 %v90_v0, 7  ;;  %v1746_v10 = vld [vmem:[%s5584_s5] sm:$0x3]  ;;  %v4994_v21 = vpack.c.bf16 %v432_v19, %v430_v17  ;;  %v77_v22 = vld [vmem:[%s5579_s0 + $0x8] sm:$0xff]  ;;  %v78_v23 = vld [vmem:[%s5579_s0 + $0x10] sm:$0xff]  ;;  %vm445_vm2 = vcmask 523264  }
  0x2a   :  { %v89_v5 = vunpack.c.0.s8 %v88_v2  ;;  %v76_v18 = vld [vmem:[%s5579_s0] sm:$0xff]  ;;  %v79_v24 = vld [vmem:[%s5579_s0 + $0x18] sm:$0xff]  ;;  %v81_v26 = vld [vmem:[%s5579_s0 + $0x28] sm:$0xff]  ;;  %vm4868_vm3 = vmmov 0   ;;  %s4806_s27 = scalar_lea.hbm %s5588_s9, 11264 }
  0x2b   :  { %v4960_v6 = vsub.s32 0, %v4957_v4  ;;  %v80_v25 = vld [vmem:[%s5579_s0 + $0x20] sm:$0xff]  ;;  %v82_v27 = vld [vmem:[%s5579_s0 + $0x30] sm:$0xff]  ;;  %v83_v28 = vld [vmem:[%s5579_s0 + $0x38] sm:$0xff]  ;;  %v5125_v50 = vsub.s32 1, %v4957_v4  ;;  %p4807_p2 = scmp.ne.s32.totalorder %s5588_s9, %s4806_s27  ;;  %p4810_p3 = scmp.lt.u32.totalorder %s4806_s27, %s5588_s9 }
  0x2c   :  { %v4963_v7 = vsub.s32 %v89_v5, %v4957_v4  ;;  %v429_v29 = vld [vmem:[%s5582_s3] sm:$0xff]  ;;  %v431_v30 = vld [vmem:[%s5582_s3 + $0x10] sm:$0xff]  ;;  %v434_v31 = vld [vmem:[%s5582_s3 + $0x28] sm:$0xff] }
  0x2d   :  { %v4979_v13 = vrot.slane %v4971_v9, %v4960_v6  ;;  %v4982_v14 = vrot.slane %v1746_v10, %v4960_v6  ;;  %v436_v32 = vld [vmem:[%s5582_s3 + $0x38] sm:$0xff]  ;;  %v5046_v33 = vpack.c.bf16 %v431_v30, %v429_v29  ;;  %v433_v35 = vld [vmem:[%s5582_s3 + $0x20] sm:$0xff]  ;;  %v435_v36 = vld [vmem:[%s5582_s3 + $0x30] sm:$0xff]  ;;  %v5129_v51 = vrot.slane %v4971_v9, %v5125_v50  ;;  %p4812_p4 = pnand %p4810_p3, %p4807_p2 }
  0x2e   :  { %v93_v12 = vrot.slane %v84_v8, %v4963_v7  ;;  %v100_v15 = vrot.slane %v86_v11, %v4963_v7  ;;  %v5048_v34 = vpack.c.bf16 %v436_v32, %v434_v31  ;;  %v438_v37 = vld [vmem:[%s5582_s3 + $0x48] sm:$0xff]  ;;  %v440_v38 = vld [vmem:[%s5582_s3 + $0x58] sm:$0xff]  ;;  %v5065_v39 = vpack.c.bf16 %v435_v36, %v433_v35  ;;  %v437_v41 = vld [vmem:[%s5582_s3 + $0x40] sm:$0xff] }
  0x2f   :  { %v5068_v40 = vpack.c.bf16 %v440_v38, %v438_v37  ;;  %v439_v42 = vld [vmem:[%s5582_s3 + $0x50] sm:$0xff]  ;;  %v442_v43 = vld [vmem:[%s5582_s3 + $0x68] sm:$0xff]  ;;  %v444_v44 = vld [vmem:[%s5582_s3 + $0x78] sm:$0xff] }
  0x30   :  { %v101_v16 = vcombine.high %v93_v12, %v93_v12  ;;  %v102_v20 = vcombine.high %v100_v15, %v100_v15  ;;  %v5085_v45 = vpack.c.bf16 %v439_v42, %v437_v41  ;;  %v5088_v46 = vpack.c.bf16 %v444_v44, %v442_v43  ;;  %v441_v47 = vld [vmem:[%s5582_s3 + $0x60] sm:$0xff]  ;;  %v443_v48 = vld [vmem:[%s5582_s3 + $0x70] sm:$0xff]  ;;  %s4866_s3 = smov 64   ;;  %v1465_v63 = vld [vmem:[#allocation7 + $0x8] sm:$0xff] }
  0x31   :  { %v5099_v49 = vpack.c.bf16 %v443_v48, %v441_v47  ;;  %v1469_v0 = vld [vmem:[#allocation7 + $0x28] sm:$0xff]  ;;  %v1464_v1 = vld [vmem:[#allocation7] sm:$0xff] }
  0x32   :  { %3946 = vmatprep.subr.msk.mxu0 %vm128_vm0, %v101_v16  ;;  %v4199_v2 = vpack.c.bf16 %v1469_v0, %v1465_v63  ;;  %v1468_v5 = vld [vmem:[#allocation7 + $0x20] sm:$0xff]  ;;  %v1473_v8 = vld [vmem:[#allocation7 + $0x48] sm:$0xff] }
  0x33   :  { %3947 = vmatpush1.msk.msra.mxu0 %vm128_vm0, %v93_v12  ;;  %v1477_v9 = vld [vmem:[#allocation7 + $0x68] sm:$0xff]  ;;  %v4201_v10 = vpack.c.bf16 %v1468_v5, %v1464_v1  ;;  %v1472_v12 = vld [vmem:[#allocation7 + $0x40] sm:$0xff] }
  0x34   :  { %3948 = vmatmul.mubr.msk.f32.vlgmr.msra.gmra.mrb[0].mxu0 %vm103_vm1, %v76_v18  ;;  %3956 = vmatprep.subr.msk.mxu0 %vm128_vm0, %v102_v20  ;;  %v4203_v11 = vpack.c.bf16 %v1477_v9, %v1473_v8  ;;  %v1481_v19 = vld [vmem:[#allocation7 + $0x88] sm:$0xff]  ;;  %v1488_v29 = vld [vmem:[#allocation7 + $0xc0] sm:$0xff] }
  0x35   :  { %3957 = vmatpush1.msk.msra.mxu0 %vm128_vm0, %v100_v15  ;;  %207 = vmatprep.mubr.f32.mxu0 %v4865_v3  ;;  %v1476_v15 = vld [vmem:[#allocation7 + $0x60] sm:$0xff]  ;;  %v1485_v20 = vld [vmem:[#allocation7 + $0xa8] sm:$0xff] }
  0x36   :  { %4072 = vmatprep.subr.bf16.mxu0 %v4994_v21  ;;  %4200 = vmatprep.subr.bf16.mxu1 %v4199_v2  ;;  %v4205_v16 = vpack.c.bf16 %v1476_v15, %v1472_v12  ;;  %v1492_v31 = vld [vmem:[#allocation7 + $0xe0] sm:$0xff] }
  0x37   :  { %4202 = vmatpush1.bf16.msra.mxu1 %v4201_v10  ;;  %v4213_v32 = vpack.c.bf16 %v1492_v31, %v1488_v29 }
  0x38   :  { %3949 = vmatmul.mubr.msk.f32.gmra.mrb[2].mxu0 %vm103_vm1, %v77_v22  ;;  %4204 = vmatprep.subr.bf16.mxu1 %v4203_v11 }
  0x39   :  { %213 = vmatprep.mubr.f32.mxu0 %v4865_v3 }
  0x3b   :  { %4206 = vmatpush1.bf16.msra.mxu1 %v4205_v16 }
  0x3c   :  { %3950 = vmatmul.mubr.msk.f32.gmra.mrb[4].mxu0 %vm103_vm1, %v78_v23 }
  0x3d   :  { %219 = vmatprep.mubr.f32.mxu0 %v4865_v3 }
  0x40   :  { %3951 = vmatmul.mubr.msk.f32.gmra.mrb[6].mxu0 %vm103_vm1, %v79_v24 }
  0x41   :  { %225 = vmatprep.mubr.f32.mxu0 %v4865_v3 }
  0x44   :  { %3952 = vmatmul.mubr.msk.f32.gmra.mrb[8].mxu0 %vm103_vm1, %v80_v25 }
  0x45   :  { %231 = vmatprep.mubr.f32.mxu0 %v4865_v3 }
  0x48   :  { %3953 = vmatmul.mubr.msk.f32.gmra.mrb[10].mxu0 %vm103_vm1, %v81_v26 }
  0x49   :  { %237 = vmatprep.mubr.f32.mxu0 %v4865_v3 }
  0x4c   :  { %3954 = vmatmul.mubr.msk.f32.gmra.mrb[12].mxu0 %vm103_vm1, %v82_v27 }
  0x4d   :  { %243 = vmatprep.mubr.f32.mxu0 %v4865_v3 }
  0x50   :  { %3955 = vmatmul.mubr.msk.f32.gmra.mrb[14].mxu0 %vm103_vm1, %v83_v28 }
  0x51   :  { %314 = vmatprep.mubr.f32.mxu0 %v4865_v3 }
  0x58   :  { %3958 = vmatmul.mubr.msk.f32.vlgmr.msra.gmra.mrb[14].mxu0 %vm103_vm1, %v76_v18 }
  0x59   :  { %4074 = vmatpush1.bf16.msra.mxu0 %v5046_v33  ;;  %320 = vmatprep.mubr.f32.mxu0 %v4865_v3 }
  0x5a   :  { %4076 = vmatprep.subr.bf16.mxu0 %v5048_v34 }
  0x5c   :  { %3959 = vmatmul.mubr.msk.f32.gmra.mrb[12].mxu0 %vm103_vm1, %v77_v22 }
  0x5d   :  { %326 = vmatprep.mubr.f32.mxu0 %v4865_v3  ;;  %4078 = vmatpush1.bf16.msra.mxu0 %v5065_v39 }
  0x5e   :  { %4080 = vmatprep.subr.bf16.mxu0 %v5068_v40 }
  0x60   :  { %3960 = vmatmul.mubr.msk.f32.gmra.mrb[10].mxu0 %vm103_vm1, %v78_v23  ;;  %v4207_v23 = vpack.c.bf16 %v1485_v20, %v1481_v19 }
  0x61   :  { %332 = vmatprep.mubr.f32.mxu0 %v4865_v3  ;;  %4082 = vmatpush1.bf16.msra.mxu0 %v5085_v45 }
  0x62   :  { %4084 = vmatprep.subr.bf16.mxu0 %v5088_v46  ;;  %4208 = vmatprep.subr.bf16.mxu1 %v4207_v23 }
  0x64   :  { %3961 = vmatmul.mubr.msk.f32.gmra.mrb[8].mxu0 %vm103_vm1, %v79_v24  ;;  %v1480_v24 = vld [vmem:[#allocation7 + $0x80] sm:$0xff] }
  0x65   :  { %338 = vmatprep.mubr.f32.mxu0 %v4865_v3  ;;  %4086 = vmatpush1.bf16.msra.mxu0 %v5099_v49 }
  0x66   :  { %4088 = vmatprep.subr.bf16.mxu0 %v4994_v21 }
  0x68   :  { %3962 = vmatmul.mubr.msk.f32.gmra.mrb[6].mxu0 %vm103_vm1, %v80_v25  ;;  %v1484_v25 = vld [vmem:[#allocation7 + $0xa0] sm:$0xff] }
  0x69   :  { %344 = vmatprep.mubr.f32.mxu0 %v4865_v3 }
  0x6c   :  { %3963 = vmatmul.mubr.msk.f32.gmra.mrb[4].mxu0 %vm103_vm1, %v81_v26  ;;  %v4209_v26 = vpack.c.bf16 %v1484_v25, %v1480_v24 }
  0x6d   :  { %350 = vmatprep.mubr.f32.mxu0 %v4865_v3 }
  0x6e   :  { %4210 = vmatpush1.bf16.msra.mxu1 %v4209_v26 }
  0x70   :  { %3964 = vmatmul.mubr.msk.f32.gmra.mrb[2].mxu0 %vm103_vm1, %v82_v27  ;;  %v1489_v27 = vld [vmem:[#allocation7 + $0xc8] sm:$0xff] }
  0x71   :  { %356 = vmatprep.mubr.f32.mxu0 %v4865_v3 }
  0x74   :  { %3965 = vmatmul.mubr.msk.f32.gmra.mrb[0].mxu0 %vm103_vm1, %v83_v28  ;;  %v1493_v28 = vld [vmem:[#allocation7 + $0xe8] sm:$0xff] }
  0x75   :  { %513 = vmatprep.mubr.f32.mxu0 %v4865_v3  ;;  %v4211_v30 = vpack.c.bf16 %v1493_v28, %v1489_v27 }
  0x77   :  { %4212 = vmatprep.subr.bf16.mxu1 %v4211_v30 }
  0x78   :  { %4214 = vmatpush1.bf16.msra.mxu1 %v4213_v32 }
  0x7c   :  { %514 = vmatmul.mubr.f32.vlgmr.msra.gmra.mrb[0].mxu0 %v4865_v3 }
  0x7d   :  { %4090 = vmatpush1.bf16.msra.mxu0 %v5046_v33  ;;  %642 = vmatprep.mubr.f32.mxu0 %v4865_v3 }
  0x7e   :  { %4092 = vmatprep.subr.bf16.mxu0 %v5048_v34 }
  0x81   :  { %4094 = vmatpush1.bf16.msra.mxu0 %v5065_v39 }
  0x82   :  { %4096 = vmatprep.subr.bf16.mxu0 %v5068_v40 }
  0x85   :  { %4098 = vmatpush1.bf16.msra.mxu0 %v5085_v45 }
  0x86   :  { %4100 = vmatprep.subr.bf16.mxu0 %v5088_v46 }
  0x89   :  { %4102 = vmatpush1.bf16.msra.mxu0 %v5099_v49 }
  0x8a   :  { %4104 = vmatprep.subr.bf16.mxu0 %v4994_v21 }
 0x14f   :  { %v515_v52 = vpop.f32.mrb[0].mxu0 }
 0x150   :  { %v517_v53 = vpop.f32.mrb[1].mxu0  ;;  %v4459_v56 = vadd.f32 %v515_v52, %v4979_v13 }
 0x151   :  { %v4460_v54 = vadd.f32 %v517_v53, %v5129_v51 }
 0x152   :  { %v3966_v57 = vmul.f32 -1.442695, %v4459_v56 }
 0x153   :  { %4569 = vtanh.f32 %v4460_v54  ;;  %v3967_v36 = vmul.f32 -1.442695, %v4460_v54 }
 0x154   :  { %4571 = vpow2.f32 %v3966_v57 }
 0x15d   :  { %v4570_v55 = vpop.eup %4569 }
 0x15e   :  { %537 = vrot.lane.b32.xlu0 %v4570_v55, %s4866_s3  ;;  %v4572_v58 = vpop.eup %4571 }
 0x15f   :  { %v528_v59 = vadd.f32 1.0, %v4572_v58 }
 0x161   :  { %4573 = vrcp.f32 %v528_v59 }
 0x16b   :  { %v4574_v60 = vpop.eup %4573 }
 0x16c   :  { %v535_v17 = vmul.f32 0.0, %v4574_v60 }
 0x1d0   :  { %v538_v61 = vpop.permute.xlu0 %537 }
 0x1d1   :  { %v540_v62 = vmul.f32 %v4574_v60, %v538_v61 }
 0x1d3   :  { %542 = vrot.lane.b32.xlu0 %v540_v62, %s4866_s3 }
 0x245   :  { %v543_v18 = vpop.permute.xlu0 %542 }
 0x246   :  { %v545_v22 = vadd.f32 %v543_v18, %v535_v17 }
 0x248   :  { %4575 = vtanh.f32 %v545_v22 }
 0x249   :  { %4577 = vpow2.f32 %v3967_v36 }
 0x252   :  { %v4576_v35 = vpop.eup %4575 }
 0x253   :  { %548 = vrot.lane.b32.xlu1 %v4576_v35, %s4866_s3  ;;  %v4578_v37 = vpop.eup %4577 }
 0x254   :  { %v529_v38 = vadd.f32 1.0, %v4578_v37 }
 0x256   :  { %4579 = vrcp.f32 %v529_v38 }
 0x260   :  { %v4580_v41 = vpop.eup %4579 }
 0x2c5   :  { %v549_v42 = vpop.permute.xlu1 %548 }
 0x2c6   :  { %v551_v43 = vmul.f32 %v4580_v41, %v549_v42 }
 0x2c8   :  { %552 = vst.msk [vmem:[#allocation2] sm:$0xff] %vm445_vm2, %v551_v43  ;;  %3968 = vmatmul.mubr.msk.f32.vlgmr.msra.gmra.mrb[2].mxu0 %vm445_vm2, %v551_v43 }
 0x2c9   :  { %4106 = vmatpush1.bf16.msra.mxu0 %v5046_v33  ;;  %771 = vmatprep.mubr.f32.mxu0 %v4865_v3 }
 0x2ca   :  { %4108 = vmatprep.subr.bf16.mxu0 %v5048_v34 }
 0x2cd   :  { %4110 = vmatpush1.bf16.msra.mxu0 %v5065_v39 }
 0x2ce   :  { %4112 = vmatprep.subr.bf16.mxu0 %v5068_v40 }
 0x2cf   :  { %v5143_v44 = vld [vmem:[#allocation2] sm:$0xff] }
 0x2d0   :  { %3989 = vmatmul.mubr.msk.f32.vlgmr.msra.gmra.mrb[0].mxu1 %vm445_vm2, %v5143_v44 }
 0x2d1   :  { %4114 = vmatpush1.bf16.msra.mxu0 %v5085_v45  ;;  %1590 = vmatprep.mubr.f32.mxu1 %v4865_v3 }
 0x2d2   :  { %4116 = vmatprep.subr.bf16.mxu0 %v5088_v46 }
 0x2d5   :  { %4118 = vmatpush1.bf16.msra.mxu0 %v5099_v49 }
 0x2d6   :  { %4120 = vmatprep.subr.bf16.mxu0 %v4994_v21 }
 0x39b   :  { %v644_v47 = vpop.f32.mrb[2].mxu0 }
 0x39c   :  { %v646_v48 = vpop.f32.mrb[3].mxu0  ;;  %v4461_v54 = vadd.f32 %v644_v47, %v4979_v13 }
 0x39d   :  { %v4462_v52 = vadd.f32 %v646_v48, %v5129_v51 }
 0x39e   :  { %v3969_v55 = vmul.f32 -1.442695, %v4461_v54 }
 0x39f   :  { %4581 = vtanh.f32 %v4462_v52  ;;  %v3970_v1 = vmul.f32 -1.442695, %v4462_v52 }
 0x3a0   :  { %4583 = vpow2.f32 %v3969_v55 }
 0x3a9   :  { %v4582_v53 = vpop.eup %4581 }
 0x3aa   :  { %666 = vrot.lane.b32.xlu1 %v4582_v53, %s4866_s3  ;;  %v4584_v56 = vpop.eup %4583 }
 0x3ab   :  { %v657_v57 = vadd.f32 1.0, %v4584_v56 }
 0x3ad   :  { %4585 = vrcp.f32 %v657_v57 }
 0x3b7   :  { %v4586_v58 = vpop.eup %4585 }
 0x3b8   :  { %v664_v61 = vmul.f32 %v4586_v58, %v545_v22 }
 0x41c   :  { %v667_v59 = vpop.permute.xlu1 %666 }
 0x41d   :  { %v669_v60 = vmul.f32 %v4586_v58, %v667_v59 }
 0x41f   :  { %671 = vrot.lane.b32.xlu0 %v669_v60, %s4866_s3 }
 0x491   :  { %v672_v62 = vpop.permute.xlu0 %671 }
 0x492   :  { %v674_v63 = vadd.f32 %v672_v62, %v664_v61 }
 0x494   :  { %4587 = vtanh.f32 %v674_v63 }
 0x495   :  { %4589 = vpow2.f32 %v3970_v1 }
 0x49e   :  { %v4588_v0 = vpop.eup %4587 }
 0x49f   :  { %677 = vrot.lane.b32.xlu1 %v4588_v0, %s4866_s3  ;;  %v4590_v2 = vpop.eup %4589 }
 0x4a0   :  { %v658_v5 = vadd.f32 1.0, %v4590_v2 }
 0x4a2   :  { %4591 = vrcp.f32 %v658_v5 }
 0x4ac   :  { %v4592_v8 = vpop.eup %4591 }
 0x511   :  { %v678_v9 = vpop.permute.xlu1 %677 }
 0x512   :  { %v680_v10 = vmul.f32 %v4592_v8, %v678_v9 }
 0x514   :  { %681 = vst.msk [vmem:[#allocation2 + $0x8] sm:$0xff] %vm445_vm2, %v680_v10  ;;  %3971 = vmatmul.mubr.msk.f32.vlgmr.msra.gmra.mrb[4].mxu0 %vm445_vm2, %v680_v10 }
 0x515   :  { %4122 = vmatpush1.bf16.msra.mxu0 %v5046_v33  ;;  %900 = vmatprep.mubr.f32.mxu0 %v4865_v3 }
 0x516   :  { %4124 = vmatprep.subr.bf16.mxu0 %v5048_v34 }
 0x519   :  { %4126 = vmatpush1.bf16.msra.mxu0 %v5065_v39 }
 0x51a   :  { %4128 = vmatprep.subr.bf16.mxu0 %v5068_v40 }
 0x51b   :  { %v5164_v11 = vld [vmem:[#allocation2 + $0x8] sm:$0xff] }
 0x51c   :  { %3990 = vmatmul.mubr.msk.f32.gmra.mrb[2].mxu1 %vm445_vm2, %v5164_v11 }
 0x51d   :  { %4130 = vmatpush1.bf16.msra.mxu0 %v5085_v45  ;;  %1596 = vmatprep.mubr.f32.mxu1 %v4865_v3 }
 0x51e   :  { %4132 = vmatprep.subr.bf16.mxu0 %v5088_v46 }
 0x521   :  { %4134 = vmatpush1.bf16.msra.mxu0 %v5099_v49 }
 0x522   :  { %4136 = vmatprep.subr.bf16.mxu0 %v4994_v21 }
 0x5e7   :  { %v773_v12 = vpop.f32.mrb[4].mxu0 }
 0x5e8   :  { %v775_v15 = vpop.f32.mrb[5].mxu0  ;;  %v4463_v18 = vadd.f32 %v773_v12, %v4979_v13 }
 0x5e9   :  { %v4464_v16 = vadd.f32 %v775_v15, %v5129_v51 }
 0x5ea   :  { %v3972_v19 = vmul.f32 -1.442695, %v4463_v18 }
 0x5eb   :  { %4593 = vtanh.f32 %v4464_v16  ;;  %v3973_v30 = vmul.f32 -1.442695, %v4464_v16 }
 0x5ec   :  { %4595 = vpow2.f32 %v3972_v19 }
 0x5f5   :  { %v4594_v17 = vpop.eup %4593 }
 0x5f6   :  { %795 = vrot.lane.b32.xlu0 %v4594_v17, %s4866_s3  ;;  %v4596_v20 = vpop.eup %4595 }
 0x5f7   :  { %v786_v22 = vadd.f32 1.0, %v4596_v20 }
 0x5f9   :  { %4597 = vrcp.f32 %v786_v22 }
 0x603   :  { %v4598_v23 = vpop.eup %4597 }
 0x604   :  { %v793_v26 = vmul.f32 %v4598_v23, %v674_v63 }
 0x668   :  { %v796_v24 = vpop.permute.xlu0 %795 }
 0x669   :  { %v798_v25 = vmul.f32 %v4598_v23, %v796_v24 }
 0x66b   :  { %800 = vrot.lane.b32.xlu1 %v798_v25, %s4866_s3 }
 0x6dd   :  { %v801_v27 = vpop.permute.xlu1 %800 }
 0x6de   :  { %v803_v28 = vadd.f32 %v801_v27, %v793_v26 }
 0x6e0   :  { %4599 = vtanh.f32 %v803_v28 }
 0x6e1   :  { %4601 = vpow2.f32 %v3973_v30 }
 0x6ea   :  { %v4600_v29 = vpop.eup %4599 }
 0x6eb   :  { %806 = vrot.lane.b32.xlu0 %v4600_v29, %s4866_s3  ;;  %v4602_v31 = vpop.eup %4601 }
 0x6ec   :  { %v787_v32 = vadd.f32 1.0, %v4602_v31 }
 0x6ee   :  { %4603 = vrcp.f32 %v787_v32 }
 0x6f8   :  { %v4604_v35 = vpop.eup %4603 }
 0x75d   :  { %v807_v36 = vpop.permute.xlu0 %806 }
 0x75e   :  { %v809_v37 = vmul.f32 %v4604_v35, %v807_v36 }
 0x760   :  { %810 = vst.msk [vmem:[#allocation2 + $0x10] sm:$0xff] %vm445_vm2, %v809_v37  ;;  %3974 = vmatmul.mubr.msk.f32.vlgmr.msra.gmra.mrb[6].mxu0 %vm445_vm2, %v809_v37 }
 0x761   :  { %4138 = vmatpush1.bf16.msra.mxu0 %v5046_v33  ;;  %1029 = vmatprep.mubr.f32.mxu0 %v4865_v3 }
 0x762   :  { %4140 = vmatprep.subr.bf16.mxu0 %v5048_v34 }
 0x765   :  { %4142 = vmatpush1.bf16.msra.mxu0 %v5065_v39 }
 0x766   :  { %4144 = vmatprep.subr.bf16.mxu0 %v5068_v40 }
 0x767   :  { %v5185_v38 = vld [vmem:[#allocation2 + $0x10] sm:$0xff] }
 0x768   :  { %3991 = vmatmul.mubr.msk.f32.gmra.mrb[4].mxu1 %vm445_vm2, %v5185_v38 }
 0x769   :  { %4146 = vmatpush1.bf16.msra.mxu0 %v5085_v45  ;;  %1602 = vmatprep.mubr.f32.mxu1 %v4865_v3 }
 0x76a   :  { %4148 = vmatprep.subr.bf16.mxu0 %v5088_v46 }
 0x76d   :  { %4150 = vmatpush1.bf16.msra.mxu0 %v5099_v49 }
 0x76e   :  { %4152 = vmatprep.subr.bf16.mxu0 %v4994_v21 }
 0x833   :  { %v902_v41 = vpop.f32.mrb[6].mxu0 }
 0x834   :  { %v904_v42 = vpop.f32.mrb[7].mxu0  ;;  %v4465_v48 = vadd.f32 %v902_v41, %v4979_v13 }
 0x835   :  { %v4466_v43 = vadd.f32 %v904_v42, %v5129_v51 }
 0x836   :  { %v3975_v52 = vmul.f32 -1.442695, %v4465_v48 }
 0x837   :  { %4605 = vtanh.f32 %v4466_v43  ;;  %v3976_v62 = vmul.f32 -1.442695, %v4466_v43 }
 0x838   :  { %4607 = vpow2.f32 %v3975_v52 }
 0x841   :  { %v4606_v47 = vpop.eup %4605 }
 0x842   :  { %924 = vrot.lane.b32.xlu1 %v4606_v47, %s4866_s3  ;;  %v4608_v53 = vpop.eup %4607 }
 0x843   :  { %v915_v54 = vadd.f32 1.0, %v4608_v53 }
 0x845   :  { %4609 = vrcp.f32 %v915_v54 }
 0x84f   :  { %v4610_v55 = vpop.eup %4609 }
 0x850   :  { %v922_v58 = vmul.f32 %v4610_v55, %v803_v28 }
 0x8b4   :  { %v925_v56 = vpop.permute.xlu1 %924 }
 0x8b5   :  { %v927_v57 = vmul.f32 %v4610_v55, %v925_v56 }
 0x8b7   :  { %929 = vrot.lane.b32.xlu0 %v927_v57, %s4866_s3 }
 0x929   :  { %v930_v59 = vpop.permute.xlu0 %929 }
 0x92a   :  { %v932_v60 = vadd.f32 %v930_v59, %v922_v58 }
 0x92c   :  { %4611 = vtanh.f32 %v932_v60 }
 0x92d   :  { %4613 = vpow2.f32 %v3976_v62 }
 0x936   :  { %v4612_v61 = vpop.eup %4611 }
 0x937   :  { %935 = vrot.lane.b32.xlu1 %v4612_v61, %s4866_s3  ;;  %v4614_v63 = vpop.eup %4613 }
 0x938   :  { %v916_v0 = vadd.f32 1.0, %v4614_v63 }
 0x93a   :  { %4615 = vrcp.f32 %v916_v0 }
 0x944   :  { %v4616_v1 = vpop.eup %4615 }
 0x9a9   :  { %v936_v2 = vpop.permute.xlu1 %935 }
 0x9aa   :  { %v938_v5 = vmul.f32 %v4616_v1, %v936_v2 }
 0x9ac   :  { %939 = vst.msk [vmem:[#allocation2 + $0x18] sm:$0xff] %vm445_vm2, %v938_v5  ;;  %3977 = vmatmul.mubr.msk.f32.vlgmr.msra.gmra.mrb[8].mxu0 %vm445_vm2, %v938_v5 }
 0x9ad   :  { %4154 = vmatpush1.bf16.msra.mxu0 %v5046_v33  ;;  %1158 = vmatprep.mubr.f32.mxu0 %v4865_v3 }
 0x9ae   :  { %4156 = vmatprep.subr.bf16.mxu0 %v5048_v34 }
 0x9b1   :  { %4158 = vmatpush1.bf16.msra.mxu0 %v5065_v39 }
 0x9b2   :  { %4160 = vmatprep.subr.bf16.mxu0 %v5068_v40 }
 0x9b3   :  { %v5206_v8 = vld [vmem:[#allocation2 + $0x18] sm:$0xff] }
 0x9b4   :  { %3992 = vmatmul.mubr.msk.f32.gmra.mrb[6].mxu1 %vm445_vm2, %v5206_v8 }
 0x9b5   :  { %4162 = vmatpush1.bf16.msra.mxu0 %v5085_v45  ;;  %1608 = vmatprep.mubr.f32.mxu1 %v4865_v3 }
 0x9b6   :  { %4164 = vmatprep.subr.bf16.mxu0 %v5088_v46 }
 0x9b9   :  { %4166 = vmatpush1.bf16.msra.mxu0 %v5099_v49 }
 0x9ba   :  { %4168 = vmatprep.subr.bf16.mxu0 %v4994_v21 }
 0xa7f   :  { %v1031_v9 = vpop.f32.mrb[8].mxu0 }
 0xa80   :  { %v1033_v10 = vpop.f32.mrb[9].mxu0  ;;  %v4467_v16 = vadd.f32 %v1031_v9, %v4979_v13 }
 0xa81   :  { %v4468_v12 = vadd.f32 %v1033_v10, %v5129_v51 }
 0xa82   :  { %v3978_v17 = vmul.f32 -1.442695, %v4467_v16 }
 0xa83   :  { %4617 = vtanh.f32 %v4468_v12  ;;  %v3979_v28 = vmul.f32 -1.442695, %v4468_v12 }
 0xa84   :  { %4619 = vpow2.f32 %v3978_v17 }
 0xa8d   :  { %v4618_v15 = vpop.eup %4617 }
 0xa8e   :  { %1053 = vrot.lane.b32.xlu0 %v4618_v15, %s4866_s3  ;;  %v4620_v18 = vpop.eup %4619 }
 0xa8f   :  { %v1044_v19 = vadd.f32 1.0, %v4620_v18 }
 0xa91   :  { %4621 = vrcp.f32 %v1044_v19 }
 0xa9b   :  { %v4622_v20 = vpop.eup %4621 }
 0xa9c   :  { %v1051_v24 = vmul.f32 %v4622_v20, %v932_v60 }
 0xb00   :  { %v1054_v22 = vpop.permute.xlu0 %1053 }
 0xb01   :  { %v1056_v23 = vmul.f32 %v4622_v20, %v1054_v22 }
 0xb03   :  { %1058 = vrot.lane.b32.xlu1 %v1056_v23, %s4866_s3 }
 0xb75   :  { %v1059_v25 = vpop.permute.xlu1 %1058 }
 0xb76   :  { %v1061_v26 = vadd.f32 %v1059_v25, %v1051_v24 }
 0xb78   :  { %4623 = vtanh.f32 %v1061_v26 }
 0xb79   :  { %4625 = vpow2.f32 %v3979_v28 }
 0xb82   :  { %v4624_v27 = vpop.eup %4623 }
 0xb83   :  { %1064 = vrot.lane.b32.xlu0 %v4624_v27, %s4866_s3  ;;  %v4626_v29 = vpop.eup %4625 }
 0xb84   :  { %v1045_v30 = vadd.f32 1.0, %v4626_v29 }
 0xb86   :  { %4627 = vrcp.f32 %v1045_v30 }
 0xb90   :  { %v4628_v31 = vpop.eup %4627 }
 0xbf5   :  { %v1065_v32 = vpop.permute.xlu0 %1064 }
 0xbf6   :  { %v1067_v35 = vmul.f32 %v4628_v31, %v1065_v32 }
 0xbf8   :  { %1068 = vst.msk [vmem:[#allocation2 + $0x20] sm:$0xff] %vm445_vm2, %v1067_v35  ;;  %3980 = vmatmul.mubr.msk.f32.vlgmr.msra.gmra.mrb[10].mxu0 %vm445_vm2, %v1067_v35 }
 0xbf9   :  { %4170 = vmatpush1.bf16.msra.mxu0 %v5046_v33  ;;  %1287 = vmatprep.mubr.f32.mxu0 %v4865_v3 }
 0xbfa   :  { %4172 = vmatprep.subr.bf16.mxu0 %v5048_v34 }
 0xbfd   :  { %4174 = vmatpush1.bf16.msra.mxu0 %v5065_v39 }
 0xbfe   :  { %4176 = vmatprep.subr.bf16.mxu0 %v5068_v40 }
 0xbff   :  { %v5227_v36 = vld [vmem:[#allocation2 + $0x20] sm:$0xff] }
 0xc00   :  { %3993 = vmatmul.mubr.msk.f32.gmra.mrb[8].mxu1 %vm445_vm2, %v5227_v36 }
 0xc01   :  { %4178 = vmatpush1.bf16.msra.mxu0 %v5085_v45  ;;  %1614 = vmatprep.mubr.f32.mxu1 %v4865_v3 }
 0xc02   :  { %4180 = vmatprep.subr.bf16.mxu0 %v5088_v46 }
 0xc05   :  { %4182 = vmatpush1.bf16.msra.mxu0 %v5099_v49 }
 0xc06   :  { %4184 = vmatprep.subr.bf16.mxu0 %v4994_v21 }
 0xccb   :  { %v1160_v37 = vpop.f32.mrb[10].mxu0 }
 0xccc   :  { %v1162_v41 = vpop.f32.mrb[11].mxu0  ;;  %v4469_v47 = vadd.f32 %v1160_v37, %v4979_v13 }
 0xccd   :  { %v4470_v42 = vadd.f32 %v1162_v41, %v5129_v51 }
 0xcce   :  { %v3981_v48 = vmul.f32 -1.442695, %v4469_v47  ;;  %v1467_v47 = vld [vmem:[#allocation7 + $0x18] sm:$0xff] }
 0xccf   :  { %4629 = vtanh.f32 %v4470_v42  ;;  %v3982_v60 = vmul.f32 -1.442695, %v4470_v42 }
 0xcd0   :  { %4631 = vpow2.f32 %v3981_v48  ;;  %v1471_v48 = vld [vmem:[#allocation7 + $0x38] sm:$0xff] }
 0xcd9   :  { %v4630_v43 = vpop.eup %4629 }
 0xcda   :  { %1182 = vrot.lane.b32.xlu1 %v4630_v43, %s4866_s3  ;;  %v4632_v52 = vpop.eup %4631 }
 0xcdb   :  { %v1173_v53 = vadd.f32 1.0, %v4632_v52  ;;  %v1466_v52 = vld [vmem:[#allocation7 + $0x10] sm:$0xff] }
 0xcdd   :  { %4633 = vrcp.f32 %v1173_v53  ;;  %v1470_v53 = vld [vmem:[#allocation7 + $0x30] sm:$0xff] }
 0xce7   :  { %v4634_v54 = vpop.eup %4633 }
 0xce8   :  { %v1180_v21 = vmul.f32 %v4634_v54, %v1061_v26 }
 0xd4c   :  { %v1183_v55 = vpop.permute.xlu1 %1182 }
 0xd4d   :  { %v1185_v56 = vmul.f32 %v4634_v54, %v1183_v55  ;;  %v1475_v54 = vld [vmem:[#allocation7 + $0x58] sm:$0xff] }
 0xd4e   :  { %v1479_v55 = vld [vmem:[#allocation7 + $0x78] sm:$0xff] }
 0xd4f   :  { %1187 = vrot.lane.b32.xlu0 %v1185_v56, %s4866_s3  ;;  %v4217_v56 = vpack.c.bf16 %v1470_v53, %v1466_v52  ;;  %v1827_v52 = vld [vmem:[#allocation10 + $0x78] sm:$0xff]  ;;  %v1824_v53 = vld [vmem:[#allocation10 + $0x60] sm:$0xff] }
 0xdc1   :  { %v1188_v57 = vpop.permute.xlu0 %1187 }
 0xdc2   :  { %v1190_v58 = vadd.f32 %v1188_v57, %v1180_v21  ;;  %v4219_v21 = vpack.c.bf16 %v1479_v55, %v1475_v54  ;;  %v1478_v57 = vld [vmem:[#allocation7 + $0x70] sm:$0xff] }
 0xdc3   :  { %v1826_v54 = vld [vmem:[#allocation10 + $0x70] sm:$0xff] }
 0xdc4   :  { %4635 = vtanh.f32 %v1190_v58 }
 0xdc5   :  { %4637 = vpow2.f32 %v3982_v60 }
 0xdce   :  { %v4636_v59 = vpop.eup %4635 }
 0xdcf   :  { %1193 = vrot.lane.b32.xlu1 %v4636_v59, %s4866_s3  ;;  %v4638_v61 = vpop.eup %4637 }
 0xdd0   :  { %v1174_v62 = vadd.f32 1.0, %v4638_v61 }
 0xdd2   :  { %4639 = vrcp.f32 %v1174_v62  ;;  %v1483_v62 = vld [vmem:[#allocation7 + $0x98] sm:$0xff] }
 0xddc   :  { %v4640_v63 = vpop.eup %4639 }
 0xe41   :  { %v1194_v0 = vpop.permute.xlu1 %1193 }
 0xe42   :  { %v1196_v1 = vmul.f32 %v4640_v63, %v1194_v0  ;;  %v1487_v63 = vld [vmem:[#allocation7 + $0xb8] sm:$0xff]  ;;  %v1482_v0 = vld [vmem:[#allocation7 + $0x90] sm:$0xff] }
 0xe44   :  { %1197 = vst.msk [vmem:[#allocation2 + $0x28] sm:$0xff] %vm445_vm2, %v1196_v1  ;;  %3983 = vmatmul.mubr.msk.f32.vlgmr.msra.gmra.mrb[12].mxu0 %vm445_vm2, %v1196_v1  ;;  %v4223_v1 = vpack.c.bf16 %v1487_v63, %v1483_v62 }
 0xe45   :  { %4186 = vmatpush1.bf16.msra.mxu0 %v5046_v33  ;;  %1416 = vmatprep.mubr.f32.mxu0 %v4865_v3 }
 0xe46   :  { %4188 = vmatprep.subr.bf16.mxu0 %v5048_v34 }
 0xe49   :  { %4190 = vmatpush1.bf16.msra.mxu0 %v5065_v39 }
 0xe4a   :  { %4192 = vmatprep.subr.bf16.mxu0 %v5068_v40 }
 0xe4b   :  { %v5248_v2 = vld [vmem:[#allocation2 + $0x28] sm:$0xff] }
 0xe4c   :  { %3994 = vmatmul.mubr.msk.f32.gmra.mrb[10].mxu1 %vm445_vm2, %v5248_v2 }
 0xe4d   :  { %4194 = vmatpush1.bf16.msra.mxu0 %v5085_v45  ;;  %1620 = vmatprep.mubr.f32.mxu1 %v4865_v3 }
 0xe4e   :  { %4196 = vmatprep.subr.bf16.mxu0 %v5088_v46 }
 0xe51   :  { %4198 = vmatpush1.bf16.msra.mxu0 %v5099_v49 }
 0xf17   :  { %v1289_v33 = vpop.f32.mrb[12].mxu0 }
 0xf18   :  { %v1291_v5 = vpop.f32.mrb[13].mxu0  ;;  %v4471_v40 = vadd.f32 %v1289_v33, %v4979_v13  ;;  %v1486_v33 = vld [vmem:[#allocation7 + $0xb0] sm:$0xff] }
 0xf19   :  { %v4472_v34 = vadd.f32 %v1291_v5, %v5129_v51  ;;  %v1491_v5 = vld [vmem:[#allocation7 + $0xd8] sm:$0xff] }
 0xf1a   :  { %v3984_v9 = vmul.f32 -1.442695, %v4471_v40 }
 0xf1b   :  { %4641 = vtanh.f32 %v4472_v34  ;;  %v3985_v19 = vmul.f32 -1.442695, %v4472_v34  ;;  %v1495_v34 = vld [vmem:[#allocation7 + $0xf8] sm:$0xff] }
 0xf1c   :  { %4643 = vpow2.f32 %v3984_v9  ;;  %v4227_v40 = vpack.c.bf16 %v1495_v34, %v1491_v5  ;;  %v1490_v9 = vld [vmem:[#allocation7 + $0xd0] sm:$0xff] }
 0xf25   :  { %v4642_v39 = vpop.eup %4641 }
 0xf26   :  { %1311 = vrot.lane.b32.xlu0 %v4642_v39, %s4866_s3  ;;  %v4644_v10 = vpop.eup %4643  ;;  %v4225_v39 = vpack.c.bf16 %v1486_v33, %v1482_v0 }
 0xf27   :  { %v1302_v45 = vadd.f32 1.0, %v4644_v10  ;;  %v1494_v10 = vld [vmem:[#allocation7 + $0xf0] sm:$0xff] }
 0xf29   :  { %4645 = vrcp.f32 %v1302_v45  ;;  %v4229_v45 = vpack.c.bf16 %v1494_v10, %v1490_v9 }
 0xf33   :  { %v4646_v12 = vpop.eup %4645 }
 0xf34   :  { %v1309_v49 = vmul.f32 %v4646_v12, %v1190_v58 }
 0xf98   :  { %v1312_v15 = vpop.permute.xlu0 %1311 }
 0xf99   :  { %v1314_v46 = vmul.f32 %v4646_v12, %v1312_v15  ;;  %v1813_v15 = vld [vmem:[#allocation10 + $0x8] sm:$0xff] }
 0xf9b   :  { %1316 = vrot.lane.b32.xlu1 %v1314_v46, %s4866_s3  ;;  %v1815_v46 = vld [vmem:[#allocation10 + $0x18] sm:$0xff] }
0x100d   :  { %v1317_v16 = vpop.permute.xlu1 %1316 }
0x100e   :  { %v1319_v17 = vadd.f32 %v1317_v16, %v1309_v49  ;;  %v5273_v49 = vpack.c.bf16 %v1815_v46, %v1813_v15 }
0x1010   :  { %4647 = vtanh.f32 %v1319_v17 }
0x1011   :  { %4649 = vpow2.f32 %v3985_v19 }
0x101a   :  { %v4648_v18 = vpop.eup %4647 }
0x101b   :  { %1322 = vrot.lane.b32.xlu0 %v4648_v18, %s4866_s3  ;;  %v4650_v20 = vpop.eup %4649 }
0x101c   :  { %v1303_v22 = vadd.f32 1.0, %v4650_v20 }
0x101e   :  { %4651 = vrcp.f32 %v1303_v22 }
0x1028   :  { %v4652_v23 = vpop.eup %4651 }
0x108d   :  { %v1323_v24 = vpop.permute.xlu0 %1322 }
0x108e   :  { %v1325_v25 = vmul.f32 %v4652_v23, %v1323_v24  ;;  %v1812_v24 = vld [vmem:[#allocation10] sm:$0xff] }
0x1090   :  { %1326 = vst.msk [vmem:[#allocation2 + $0x30] sm:$0xff] %vm445_vm2, %v1325_v25  ;;  %3986 = vmatmul.mubr.msk.f32.vlgmr.msra.gmra.mrb[14].mxu0 %vm445_vm2, %v1325_v25  ;;  %v1814_v25 = vld [vmem:[#allocation10 + $0x10] sm:$0xff] }
0x1091   :  { %4068 = vmatprep.mubr.msk.f32.mxu0 %vm4868_vm3, %v4865_v3 }
0x1097   :  { %v5263_v26 = vld [vmem:[#allocation2 + $0x30] sm:$0xff] }
0x1098   :  { %3995 = vmatmul.mubr.msk.f32.gmra.mrb[12].mxu1 %vm445_vm2, %v5263_v26 }
0x1099   :  { %1626 = vmatprep.mubr.f32.mxu1 %v4865_v3 }
0x1163   :  { %v1418_v27 = vpop.f32.mrb[14].mxu0 }
0x1164   :  { %v1420_v28 = vpop.f32.mrb[15].mxu0  ;;  %v4473_v31 = vadd.f32 %v1418_v27, %v4979_v13  ;;  %v1474_v13 = vld [vmem:[#allocation7 + $0x50] sm:$0xff]  ;;  %v1817_v27 = vld [vmem:[#allocation10 + $0x28] sm:$0xff] }
0x1165   :  { %v4474_v29 = vadd.f32 %v1420_v28, %v5129_v51  ;;  %v4215_v51 = vpack.c.bf16 %v1471_v48, %v1467_v47  ;;  %v4221_v58 = vpack.c.bf16 %v1478_v57, %v1474_v13  ;;  %v1819_v28 = vld [vmem:[#allocation10 + $0x38] sm:$0xff]  ;;  %v1822_v47 = vld [vmem:[#allocation10 + $0x50] sm:$0xff]  ;;  %v1825_v48 = vld [vmem:[#allocation10 + $0x68] sm:$0xff] }
0x1166   :  { %v3987_v32 = vmul.f32 -1.442695, %v4473_v31  ;;  %v1816_v31 = vld [vmem:[#allocation10 + $0x20] sm:$0xff] }
0x1167   :  { %4653 = vtanh.f32 %v4474_v29  ;;  %4216 = vmatprep.subr.bf16.mxu1 %v4215_v51  ;;  %v3988_v16 = vmul.f32 -1.442695, %v4474_v29  ;;  %v5281_v29 = vpack.c.bf16 %v1819_v28, %v1817_v27  ;;  %v5299_v51 = vpack.c.bf16 %v1827_v52, %v1825_v48 }
0x1168   :  { %4655 = vpow2.f32 %v3987_v32  ;;  %4218 = vmatpush1.bf16.msra.mxu1 %v4217_v56  ;;  %v1818_v32 = vld [vmem:[#allocation10 + $0x30] sm:$0xff] }
0x1169   :  { %4220 = vmatprep.subr.bf16.mxu1 %v4219_v21 }
0x116c   :  { %4222 = vmatpush1.bf16.msra.mxu1 %v4221_v58 }
0x116d   :  { %4224 = vmatprep.subr.bf16.mxu1 %v4223_v1 }
0x1170   :  { %4226 = vmatpush1.bf16.msra.mxu1 %v4225_v39 }
0x1171   :  { %v4654_v30 = vpop.eup %4653  ;;  %4228 = vmatprep.subr.bf16.mxu1 %v4227_v40 }
0x1172   :  { %1440 = vrot.lane.b32.xlu1 %v4654_v30, %s4866_s3  ;;  %v4656_v35 = vpop.eup %4655  ;;  %v5279_v30 = vpack.c.bf16 %v1814_v25, %v1812_v24 }
0x1173   :  { %v1431_v37 = vadd.f32 1.0, %v4656_v35  ;;  %v1821_v35 = vld [vmem:[#allocation10 + $0x48] sm:$0xff] }
0x1174   :  { %4230 = vmatpush1.bf16.msra.mxu1 %v4229_v45 }
0x1175   :  { %4657 = vrcp.f32 %v1431_v37  ;;  %4232 = vmatprep.subr.bf16.mxu1 %v5273_v49  ;;  %v1823_v37 = vld [vmem:[#allocation10 + $0x58] sm:$0xff] }
0x117f   :  { %v4658_v41 = vpop.eup %4657 }
0x1180   :  { %v1438_v59 = vmul.f32 %v4658_v41, %v1319_v17 }
0x11e4   :  { %v1441_v42 = vpop.permute.xlu1 %1440 }
0x11e5   :  { %v1443_v43 = vmul.f32 %v4658_v41, %v1441_v42  ;;  %v5287_v41 = vpack.c.bf16 %v1818_v32, %v1816_v31  ;;  %v5290_v42 = vpack.c.bf16 %v1823_v37, %v1821_v35 }
0x11e7   :  { %1445 = vrot.lane.b32.xlu0 %v1443_v43, %s4866_s3  ;;  %v1820_v43 = vld [vmem:[#allocation10 + $0x40] sm:$0xff] }
0x1259   :  { %v1446_v60 = vpop.permute.xlu0 %1445 }
0x125a   :  { %v1448_v61 = vadd.f32 %v1446_v60, %v1438_v59 }
0x125c   :  { %4659 = vtanh.f32 %v1448_v61 }
0x125d   :  { %4661 = vpow2.f32 %v3988_v16 }
0x1266   :  { %v4660_v12 = vpop.eup %4659 }
0x1267   :  { %1451 = vrot.lane.b32.xlu1 %v4660_v12, %s4866_s3  ;;  %v4662_v17 = vpop.eup %4661 }
0x1268   :  { %v1432_v18 = vadd.f32 1.0, %v4662_v17 }
0x126a   :  { %4663 = vrcp.f32 %v1432_v18 }
0x1274   :  { %v4664_v19 = vpop.eup %4663 }
0x12d9   :  { %v1452_v20 = vpop.permute.xlu1 %1451 }
0x12da   :  { %v1454_v22 = vmul.f32 %v4664_v19, %v1452_v20 }
0x12dc   :  { %1455 = vst.msk [vmem:[#allocation2 + $0x38] sm:$0xff] %vm445_vm2, %v1454_v22 }
0x12e3   :  { %v1463_v23 = vld [vmem:[#allocation2 + $0x38] sm:$0xff] }
0x12e4   :  { %3996 = vmatmul.mubr.msk.f32.gmra.mrb[14].mxu1 %vm445_vm2, %v1463_v23 }
0x12e5   :  { %1697 = vmatprep.mubr.f32.mxu1 %v4865_v3 }
0x12ec   :  { %3997 = vmatmul.mubr.msk.f32.vlgmr.msra.gmra.mrb[14].mxu1 %vm445_vm2, %v5143_v44  ;;  %v5296_v44 = vpack.c.bf16 %v1822_v47, %v1820_v43 }
0x12ed   :  { %4234 = vmatpush1.bf16.msra.mxu1 %v5279_v30  ;;  %1703 = vmatprep.mubr.f32.mxu1 %v4865_v3 }
0x12ee   :  { %4236 = vmatprep.subr.bf16.mxu1 %v5281_v29 }
0x12f0   :  { %3998 = vmatmul.mubr.msk.f32.gmra.mrb[12].mxu1 %vm445_vm2, %v5164_v11  ;;  %v5305_v11 = vpack.c.bf16 %v1826_v54, %v1824_v53 }
0x12f1   :  { %1709 = vmatprep.mubr.f32.mxu1 %v4865_v3  ;;  %4238 = vmatpush1.bf16.msra.mxu1 %v5287_v41 }
0x12f2   :  { %4240 = vmatprep.subr.bf16.mxu1 %v5290_v42 }
0x12f4   :  { %3999 = vmatmul.mubr.msk.f32.gmra.mrb[10].mxu1 %vm445_vm2, %v5185_v38  ;;  %v4761_v38 = vld [vmem:[%s5584_s5] sm:$0x3] }
0x12f5   :  { %1715 = vmatprep.mubr.f32.mxu1 %v4865_v3  ;;  %4242 = vmatpush1.bf16.msra.mxu1 %v5296_v44 }
0x12f6   :  { %4244 = vmatprep.subr.bf16.mxu1 %v5299_v51 }
0x12f8   :  { %4000 = vmatmul.mubr.msk.f32.gmra.mrb[8].mxu1 %vm445_vm2, %v5206_v8  ;;  %v5338_v8 = vrot.slane %v4761_v38, %v5125_v50 }
0x12f9   :  { %1721 = vmatprep.mubr.f32.mxu1 %v4865_v3  ;;  %4246 = vmatpush1.bf16.msra.mxu1 %v5305_v11 }
0x12fa   :  { %4248 = vmatprep.subr.bf16.mxu1 %v5273_v49 }
0x12fc   :  { %4001 = vmatmul.mubr.msk.f32.gmra.mrb[6].mxu1 %vm445_vm2, %v5227_v36 }
0x12fd   :  { %1727 = vmatprep.mubr.f32.mxu1 %v4865_v3 }
0x1300   :  { %4002 = vmatmul.mubr.msk.f32.gmra.mrb[4].mxu1 %vm445_vm2, %v5248_v2 }
0x1301   :  { %1733 = vmatprep.mubr.f32.mxu1 %v4865_v3 }
0x1304   :  { %4003 = vmatmul.mubr.msk.f32.gmra.mrb[2].mxu1 %vm445_vm2, %v5263_v26 }
0x1305   :  { %1739 = vmatprep.mubr.f32.mxu1 %v4865_v3 }
0x1308   :  { %4004 = vmatmul.mubr.msk.f32.gmra.mrb[0].mxu1 %vm445_vm2, %v1463_v23 }
0x1309   :  { %1892 = vmatprep.mubr.f32.mxu1 %v4865_v3 }
0x1310   :  { %1893 = vmatmul.mubr.f32.vlgmr.msra.gmra.mrb[0].mxu1 %v4865_v3 }
0x1311   :  { %4250 = vmatpush1.bf16.msra.mxu1 %v5279_v30  ;;  %2004 = vmatprep.mubr.f32.mxu1 %v4865_v3 }
0x1312   :  { %4252 = vmatprep.subr.bf16.mxu1 %v5281_v29 }
0x1315   :  { %4254 = vmatpush1.bf16.msra.mxu1 %v5287_v41 }
0x1316   :  { %4256 = vmatprep.subr.bf16.mxu1 %v5290_v42 }
0x1319   :  { %4258 = vmatpush1.bf16.msra.mxu1 %v5296_v44 }
0x131a   :  { %4260 = vmatprep.subr.bf16.mxu1 %v5299_v51 }
0x131d   :  { %4262 = vmatpush1.bf16.msra.mxu1 %v5305_v11 }
0x131e   :  { %4264 = vmatprep.subr.bf16.mxu1 %v5273_v49 }
0x13e3   :  { %v1894_v36 = vpop.f32.mrb[0].mxu1 }
0x13e4   :  { %v1896_v2 = vpop.f32.mrb[1].mxu1  ;;  %v4475_v56 = vadd.f32 %v1894_v36, %v4982_v14 }
0x13e5   :  { %v4476_v26 = vadd.f32 %v1896_v2, %v5338_v8 }
0x13e6   :  { %v4005_v21 = vmul.f32 -1.442695, %v4475_v56 }
0x13e7   :  { %4665 = vtanh.f32 %v4476_v26  ;;  %v4006_v1 = vmul.f32 -1.442695, %v4476_v26 }
0x13e8   :  { %4667 = vpow2.f32 %v4005_v21 }
0x13f1   :  { %v4666_v55 = vpop.eup %4665 }
0x13f2   :  { %1916 = vrot.lane.b32.xlu0 %v4666_v55, %s4866_s3  ;;  %v4668_v13 = vpop.eup %4667 }
0x13f3   :  { %v1907_v57 = vadd.f32 1.0, %v4668_v13 }
0x13f5   :  { %4669 = vrcp.f32 %v1907_v57 }
0x13ff   :  { %v4670_v58 = vpop.eup %4669 }
0x1400   :  { %v1914_v61 = vmul.f32 0.0, %v4670_v58 }
0x1464   :  { %v1917_v59 = vpop.permute.xlu0 %1916 }
0x1465   :  { %v1919_v60 = vmul.f32 %v4670_v58, %v1917_v59 }
0x1467   :  { %1921 = vrot.lane.b32.xlu1 %v1919_v60, %s4866_s3 }
0x14d9   :  { %v1922_v62 = vpop.permute.xlu1 %1921 }
0x14da   :  { %v1924_v63 = vadd.f32 %v1922_v62, %v1914_v61 }
0x14dc   :  { %4671 = vtanh.f32 %v1924_v63 }
0x14dd   :  { %4673 = vpow2.f32 %v4006_v1 }
0x14e6   :  { %v4672_v0 = vpop.eup %4671 }
0x14e7   :  { %1927 = vrot.lane.b32.xlu0 %v4672_v0, %s4866_s3  ;;  %v4674_v33 = vpop.eup %4673 }
0x14e8   :  { %v1908_v5 = vadd.f32 1.0, %v4674_v33 }
0x14ea   :  { %4675 = vrcp.f32 %v1908_v5 }
0x14f4   :  { %v4676_v34 = vpop.eup %4675 }
0x1559   :  { %v1928_v39 = vpop.permute.xlu0 %1927 }
0x155a   :  { %v1930_v40 = vmul.f32 %v4676_v34, %v1928_v39 }
0x155c   :  { %4007 = vmatmul.mubr.msk.f32.vlgmr.msra.gmra.mrb[2].mxu1 %vm445_vm2, %v1930_v40 }
0x155d   :  { %4266 = vmatpush1.bf16.msra.mxu1 %v5279_v30  ;;  %2116 = vmatprep.mubr.f32.mxu1 %v4865_v3 }
0x155e   :  { %4268 = vmatprep.subr.bf16.mxu1 %v5281_v29 }
0x1561   :  { %4270 = vmatpush1.bf16.msra.mxu1 %v5287_v41 }
0x1562   :  { %4272 = vmatprep.subr.bf16.mxu1 %v5290_v42 }
0x1565   :  { %4274 = vmatpush1.bf16.msra.mxu1 %v5296_v44 }
0x1566   :  { %4276 = vmatprep.subr.bf16.mxu1 %v5299_v51 }
0x1569   :  { %4278 = vmatpush1.bf16.msra.mxu1 %v5305_v11 }
0x156a   :  { %4280 = vmatprep.subr.bf16.mxu1 %v5273_v49 }
0x162f   :  { %v2006_v9 = vpop.f32.mrb[2].mxu1 }
0x1630   :  { %v2008_v10 = vpop.f32.mrb[3].mxu1  ;;  %v4477_v15 = vadd.f32 %v2006_v9, %v4982_v14 }
0x1631   :  { %v4478_v45 = vadd.f32 %v2008_v10, %v5338_v8 }
0x1632   :  { %v4008_v46 = vmul.f32 -1.442695, %v4477_v15 }
0x1633   :  { %4677 = vtanh.f32 %v4478_v45  ;;  %v4009_v27 = vmul.f32 -1.442695, %v4478_v45 }
0x1634   :  { %4679 = vpow2.f32 %v4008_v46 }
0x163d   :  { %v4678_v12 = vpop.eup %4677 }
0x163e   :  { %2028 = vrot.lane.b32.xlu1 %v4678_v12, %s4866_s3  ;;  %v4680_v16 = vpop.eup %4679 }
0x163f   :  { %v2019_v17 = vadd.f32 1.0, %v4680_v16 }
0x1641   :  { %4681 = vrcp.f32 %v2019_v17 }
0x164b   :  { %v4682_v18 = vpop.eup %4681 }
0x164c   :  { %v2026_v22 = vmul.f32 %v4682_v18, %v1924_v63 }
0x16b0   :  { %v2029_v19 = vpop.permute.xlu1 %2028 }
0x16b1   :  { %v2031_v20 = vmul.f32 %v4682_v18, %v2029_v19 }
0x16b3   :  { %2033 = vrot.lane.b32.xlu0 %v2031_v20, %s4866_s3 }
0x1725   :  { %v2034_v23 = vpop.permute.xlu0 %2033 }
0x1726   :  { %v2036_v24 = vadd.f32 %v2034_v23, %v2026_v22 }
0x1728   :  { %4683 = vtanh.f32 %v2036_v24 }
0x1729   :  { %4685 = vpow2.f32 %v4009_v27 }
0x1732   :  { %v4684_v25 = vpop.eup %4683 }
0x1733   :  { %2039 = vrot.lane.b32.xlu1 %v4684_v25, %s4866_s3  ;;  %v4686_v28 = vpop.eup %4685 }
0x1734   :  { %v2020_v31 = vadd.f32 1.0, %v4686_v28 }
0x1736   :  { %4687 = vrcp.f32 %v2020_v31 }
0x1740   :  { %v4688_v32 = vpop.eup %4687 }
0x17a5   :  { %v2040_v35 = vpop.permute.xlu1 %2039 }
0x17a6   :  { %v2042_v37 = vmul.f32 %v4688_v32, %v2040_v35 }
0x17a8   :  { %4010 = vmatmul.mubr.msk.f32.vlgmr.msra.gmra.mrb[4].mxu1 %vm445_vm2, %v2042_v37 }
0x17a9   :  { %4282 = vmatpush1.bf16.msra.mxu1 %v5279_v30  ;;  %2228 = vmatprep.mubr.f32.mxu1 %v4865_v3 }
0x17aa   :  { %4284 = vmatprep.subr.bf16.mxu1 %v5281_v29 }
0x17ad   :  { %4286 = vmatpush1.bf16.msra.mxu1 %v5287_v41 }
0x17ae   :  { %4288 = vmatprep.subr.bf16.mxu1 %v5290_v42 }
0x17b1   :  { %4290 = vmatpush1.bf16.msra.mxu1 %v5296_v44 }
0x17b2   :  { %4292 = vmatprep.subr.bf16.mxu1 %v5299_v51 }
0x17b5   :  { %4294 = vmatpush1.bf16.msra.mxu1 %v5305_v11 }
0x17b6   :  { %4296 = vmatprep.subr.bf16.mxu1 %v5273_v49 }
0x187b   :  { %v2118_v43 = vpop.f32.mrb[4].mxu1 }
0x187c   :  { %v2120_v47 = vpop.f32.mrb[5].mxu1  ;;  %v4479_v53 = vadd.f32 %v2118_v43, %v4982_v14 }
0x187d   :  { %v4480_v48 = vadd.f32 %v2120_v47, %v5338_v8 }
0x187e   :  { %v4011_v54 = vmul.f32 -1.442695, %v4479_v53 }
0x187f   :  { %4689 = vtanh.f32 %v4480_v48  ;;  %v4012_v58 = vmul.f32 -1.442695, %v4480_v48 }
0x1880   :  { %4691 = vpow2.f32 %v4011_v54 }
0x1889   :  { %v4690_v52 = vpop.eup %4689 }
0x188a   :  { %2140 = vrot.lane.b32.xlu0 %v4690_v52, %s4866_s3  ;;  %v4692_v38 = vpop.eup %4691 }
0x188b   :  { %v2131_v36 = vadd.f32 1.0, %v4692_v38 }
0x188d   :  { %4693 = vrcp.f32 %v2131_v36 }
0x1897   :  { %v4694_v2 = vpop.eup %4693 }
0x1898   :  { %v2138_v56 = vmul.f32 %v4694_v2, %v2036_v24 }
0x18fc   :  { %v2141_v26 = vpop.permute.xlu0 %2140 }
0x18fd   :  { %v2143_v55 = vmul.f32 %v4694_v2, %v2141_v26 }
0x18ff   :  { %2145 = vrot.lane.b32.xlu1 %v2143_v55, %s4866_s3 }
0x1971   :  { %v2146_v21 = vpop.permute.xlu1 %2145 }
0x1972   :  { %v2148_v13 = vadd.f32 %v2146_v21, %v2138_v56 }
0x1974   :  { %4695 = vtanh.f32 %v2148_v13 }
0x1975   :  { %4697 = vpow2.f32 %v4012_v58 }
0x197e   :  { %v4696_v57 = vpop.eup %4695 }
0x197f   :  { %2151 = vrot.lane.b32.xlu0 %v4696_v57, %s4866_s3  ;;  %v4698_v59 = vpop.eup %4697 }
0x1980   :  { %v2132_v60 = vadd.f32 1.0, %v4698_v59 }
0x1982   :  { %4699 = vrcp.f32 %v2132_v60 }
0x198c   :  { %v4700_v61 = vpop.eup %4699 }
0x19f1   :  { %v2152_v62 = vpop.permute.xlu0 %2151 }
0x19f2   :  { %v2154_v63 = vmul.f32 %v4700_v61, %v2152_v62 }
0x19f4   :  { %4013 = vmatmul.mubr.msk.f32.vlgmr.msra.gmra.mrb[6].mxu1 %vm445_vm2, %v2154_v63 }
0x19f5   :  { %4298 = vmatpush1.bf16.msra.mxu1 %v5279_v30  ;;  %2340 = vmatprep.mubr.f32.mxu1 %v4865_v3 }
0x19f6   :  { %4300 = vmatprep.subr.bf16.mxu1 %v5281_v29 }
0x19f9   :  { %4302 = vmatpush1.bf16.msra.mxu1 %v5287_v41 }
0x19fa   :  { %4304 = vmatprep.subr.bf16.mxu1 %v5290_v42 }
0x19fd   :  { %4306 = vmatpush1.bf16.msra.mxu1 %v5296_v44 }
0x19fe   :  { %4308 = vmatprep.subr.bf16.mxu1 %v5299_v51 }
0x1a01   :  { %4310 = vmatpush1.bf16.msra.mxu1 %v5305_v11 }
0x1a02   :  { %4312 = vmatprep.subr.bf16.mxu1 %v5273_v49 }
0x1ac7   :  { %v2230_v0 = vpop.f32.mrb[6].mxu1 }
0x1ac8   :  { %v2232_v1 = vpop.f32.mrb[7].mxu1  ;;  %v4481_v34 = vadd.f32 %v2230_v0, %v4982_v14 }
0x1ac9   :  { %v4482_v33 = vadd.f32 %v2232_v1, %v5338_v8 }
0x1aca   :  { %v4014_v39 = vmul.f32 -1.442695, %v4481_v34 }
0x1acb   :  { %4701 = vtanh.f32 %v4482_v33  ;;  %v4015_v18 = vmul.f32 -1.442695, %v4482_v33 }
0x1acc   :  { %4703 = vpow2.f32 %v4014_v39 }
0x1ad5   :  { %v4702_v5 = vpop.eup %4701 }
0x1ad6   :  { %2252 = vrot.lane.b32.xlu1 %v4702_v5, %s4866_s3  ;;  %v4704_v40 = vpop.eup %4703 }
0x1ad7   :  { %v2243_v9 = vadd.f32 1.0, %v4704_v40 }
0x1ad9   :  { %4705 = vrcp.f32 %v2243_v9 }
0x1ae3   :  { %v4706_v10 = vpop.eup %4705 }
0x1ae4   :  { %v2250_v15 = vmul.f32 %v4706_v10, %v2148_v13 }
0x1b48   :  { %v2253_v45 = vpop.permute.xlu1 %2252 }
0x1b49   :  { %v2255_v12 = vmul.f32 %v4706_v10, %v2253_v45 }
0x1b4b   :  { %2257 = vrot.lane.b32.xlu0 %v2255_v12, %s4866_s3 }
0x1bbd   :  { %v2258_v46 = vpop.permute.xlu0 %2257 }
0x1bbe   :  { %v2260_v16 = vadd.f32 %v2258_v46, %v2250_v15 }
0x1bc0   :  { %4707 = vtanh.f32 %v2260_v16 }
0x1bc1   :  { %4709 = vpow2.f32 %v4015_v18 }
0x1bca   :  { %v4708_v17 = vpop.eup %4707 }
0x1bcb   :  { %2263 = vrot.lane.b32.xlu1 %v4708_v17, %s4866_s3  ;;  %v4710_v19 = vpop.eup %4709 }
0x1bcc   :  { %v2244_v20 = vadd.f32 1.0, %v4710_v19 }
0x1bce   :  { %4711 = vrcp.f32 %v2244_v20 }
0x1bd8   :  { %v4712_v22 = vpop.eup %4711 }
0x1c3d   :  { %v2264_v23 = vpop.permute.xlu1 %2263 }
0x1c3e   :  { %v2266_v24 = vmul.f32 %v4712_v22, %v2264_v23 }
0x1c40   :  { %4016 = vmatmul.mubr.msk.f32.vlgmr.msra.gmra.mrb[8].mxu1 %vm445_vm2, %v2266_v24 }
0x1c41   :  { %4314 = vmatpush1.bf16.msra.mxu1 %v5279_v30  ;;  %2452 = vmatprep.mubr.f32.mxu1 %v4865_v3 }
0x1c42   :  { %4316 = vmatprep.subr.bf16.mxu1 %v5281_v29 }
0x1c45   :  { %4318 = vmatpush1.bf16.msra.mxu1 %v5287_v41 }
0x1c46   :  { %4320 = vmatprep.subr.bf16.mxu1 %v5290_v42 }
0x1c49   :  { %4322 = vmatpush1.bf16.msra.mxu1 %v5296_v44 }
0x1c4a   :  { %4324 = vmatprep.subr.bf16.mxu1 %v5299_v51 }
0x1c4d   :  { %4326 = vmatpush1.bf16.msra.mxu1 %v5305_v11 }
0x1c4e   :  { %4328 = vmatprep.subr.bf16.mxu1 %v5273_v49 }
0x1d13   :  { %v2342_v25 = vpop.f32.mrb[8].mxu1 }
0x1d14   :  { %v2344_v27 = vpop.f32.mrb[9].mxu1  ;;  %v4483_v32 = vadd.f32 %v2342_v25, %v4982_v14 }
0x1d15   :  { %v4484_v28 = vadd.f32 %v2344_v27, %v5338_v8 }
0x1d16   :  { %v4017_v35 = vmul.f32 -1.442695, %v4483_v32 }
0x1d17   :  { %4713 = vtanh.f32 %v4484_v28  ;;  %v4018_v2 = vmul.f32 -1.442695, %v4484_v28 }
0x1d18   :  { %4715 = vpow2.f32 %v4017_v35 }
0x1d21   :  { %v4714_v31 = vpop.eup %4713 }
0x1d22   :  { %2364 = vrot.lane.b32.xlu0 %v4714_v31, %s4866_s3  ;;  %v4716_v37 = vpop.eup %4715 }
0x1d23   :  { %v2355_v43 = vadd.f32 1.0, %v4716_v37 }
0x1d25   :  { %4717 = vrcp.f32 %v2355_v43 }
0x1d2f   :  { %v4718_v47 = vpop.eup %4717 }
0x1d30   :  { %v2362_v53 = vmul.f32 %v4718_v47, %v2260_v16 }
0x1d94   :  { %v2365_v48 = vpop.permute.xlu0 %2364 }
0x1d95   :  { %v2367_v52 = vmul.f32 %v4718_v47, %v2365_v48 }
0x1d97   :  { %2369 = vrot.lane.b32.xlu1 %v2367_v52, %s4866_s3 }
0x1e09   :  { %v2370_v54 = vpop.permute.xlu1 %2369 }
0x1e0a   :  { %v2372_v38 = vadd.f32 %v2370_v54, %v2362_v53 }
0x1e0c   :  { %4719 = vtanh.f32 %v2372_v38 }
0x1e0d   :  { %4721 = vpow2.f32 %v4018_v2 }
0x1e16   :  { %v4720_v36 = vpop.eup %4719 }
0x1e17   :  { %2375 = vrot.lane.b32.xlu0 %v4720_v36, %s4866_s3  ;;  %v4722_v26 = vpop.eup %4721 }
0x1e18   :  { %v2356_v55 = vadd.f32 1.0, %v4722_v26 }
0x1e1a   :  { %4723 = vrcp.f32 %v2356_v55  ;;  %v2716_v55 = vld [vmem:[%s5586_s7 + $0x8] sm:$0xff] }
0x1e24   :  { %v4724_v56 = vpop.eup %4723 }
0x1e89   :  { %v2376_v21 = vpop.permute.xlu0 %2375 }
0x1e8a   :  { %v2378_v13 = vmul.f32 %v4724_v56, %v2376_v21  ;;  %v4867_v56 = vmov 0.0|0.0  }
0x1e8b   :  { %4359 = vmatprep.subr.bf16.mxu0 %v4867_v56 }
0x1e8c   :  { %4019 = vmatmul.mubr.msk.f32.vlgmr.msra.gmra.mrb[10].mxu1 %vm445_vm2, %v2378_v13  ;;  %v2718_v13 = vld [vmem:[%s5586_s7 + $0x18] sm:$0xff] }
0x1e8d   :  { %4330 = vmatpush1.bf16.msra.mxu1 %v5279_v30  ;;  %2564 = vmatprep.mubr.f32.mxu1 %v4865_v3 }
0x1e8e   :  { %4332 = vmatprep.subr.bf16.mxu1 %v5281_v29 }
0x1e91   :  { %4334 = vmatpush1.bf16.msra.mxu1 %v5287_v41 }
0x1e92   :  { %4336 = vmatprep.subr.bf16.mxu1 %v5290_v42 }
0x1e95   :  { %4338 = vmatpush1.bf16.msra.mxu1 %v5296_v44 }
0x1e96   :  { %4340 = vmatprep.subr.bf16.mxu1 %v5299_v51 }
0x1e99   :  { %4342 = vmatpush1.bf16.msra.mxu1 %v5305_v11 }
0x1e9a   :  { %4344 = vmatprep.subr.bf16.mxu1 %v5273_v49 }
0x1f5f   :  { %v2454_v57 = vpop.f32.mrb[10].mxu1 }
0x1f60   :  { %v2456_v58 = vpop.f32.mrb[11].mxu1  ;;  %v4485_v61 = vadd.f32 %v2454_v57, %v4982_v14 }
0x1f61   :  { %v4486_v59 = vadd.f32 %v2456_v58, %v5338_v8  ;;  %v2719_v58 = vld [vmem:[%s5586_s7 + $0x20] sm:$0xff] }
0x1f62   :  { %v4020_v62 = vmul.f32 -1.442695, %v4485_v61  ;;  %v2721_v61 = vld [vmem:[%s5586_s7 + $0x30] sm:$0xff] }
0x1f63   :  { %4725 = vtanh.f32 %v4486_v59  ;;  %v4021_v9 = vmul.f32 -1.442695, %v4486_v59  ;;  %v2720_v59 = vld [vmem:[%s5586_s7 + $0x28] sm:$0xff] }
0x1f64   :  { %4727 = vpow2.f32 %v4020_v62  ;;  %v2722_v62 = vld [vmem:[%s5586_s7 + $0x38] sm:$0xff] }
0x1f6d   :  { %v4726_v60 = vpop.eup %4725 }
0x1f6e   :  { %2476 = vrot.lane.b32.xlu1 %v4726_v60, %s4866_s3  ;;  %v4728_v63 = vpop.eup %4727  ;;  %v4366_v60 = vpack.c.bf16 %v2720_v59, %v2719_v58 }
0x1f6f   :  { %v2467_v0 = vadd.f32 1.0, %v4728_v63  ;;  %v4369_v63 = vpack.c.bf16 %v2722_v62, %v2721_v61 }
0x1f71   :  { %4729 = vrcp.f32 %v2467_v0 }
0x1f7b   :  { %v4730_v1 = vpop.eup %4729 }
0x1f7c   :  { %v2474_v49 = vmul.f32 %v4730_v1, %v2372_v38 }
0x1fe0   :  { %v2477_v33 = vpop.permute.xlu1 %2476 }
0x1fe1   :  { %v2479_v5 = vmul.f32 %v4730_v1, %v2477_v33 }
0x1fe3   :  { %2481 = vrot.lane.b32.xlu0 %v2479_v5, %s4866_s3 }
0x2055   :  { %v2482_v34 = vpop.permute.xlu0 %2481 }
0x2056   :  { %v2484_v39 = vadd.f32 %v2482_v34, %v2474_v49 }
0x2058   :  { %4731 = vtanh.f32 %v2484_v39 }
0x2059   :  { %4733 = vpow2.f32 %v4021_v9 }
0x2062   :  { %v4732_v40 = vpop.eup %4731 }
0x2063   :  { %2487 = vrot.lane.b32.xlu1 %v4732_v40, %s4866_s3  ;;  %v4734_v10 = vpop.eup %4733 }
0x2064   :  { %v2468_v45 = vadd.f32 1.0, %v4734_v10 }
0x2066   :  { %4735 = vrcp.f32 %v2468_v45 }
0x2070   :  { %v4736_v12 = vpop.eup %4735 }
0x20d5   :  { %v2488_v15 = vpop.permute.xlu1 %2487 }
0x20d6   :  { %v2490_v46 = vmul.f32 %v4736_v12, %v2488_v15 }
0x20d8   :  { %4022 = vmatmul.mubr.msk.f32.vlgmr.msra.gmra.mrb[12].mxu1 %vm445_vm2, %v2490_v46 }
0x20d9   :  { %4346 = vmatpush1.bf16.msra.mxu1 %v5279_v30  ;;  %2676 = vmatprep.mubr.f32.mxu1 %v4865_v3 }
0x20da   :  { %4348 = vmatprep.subr.bf16.mxu1 %v5281_v29 }
0x20dd   :  { %4350 = vmatpush1.bf16.msra.mxu1 %v5287_v41 }
0x20de   :  { %4352 = vmatprep.subr.bf16.mxu1 %v5290_v42 }
0x20e1   :  { %4354 = vmatpush1.bf16.msra.mxu1 %v5296_v44 }
0x20e2   :  { %4356 = vmatprep.subr.bf16.mxu1 %v5299_v51 }
0x20e5   :  { %4358 = vmatpush1.bf16.msra.mxu1 %v5305_v11 }
0x21ab   :  { %v2566_v16 = vpop.f32.mrb[12].mxu1 }
0x21ac   :  { %v2568_v17 = vpop.f32.mrb[13].mxu1  ;;  %v4487_v29 = vadd.f32 %v2566_v16, %v4982_v14 }
0x21ad   :  { %v4488_v18 = vadd.f32 %v2568_v17, %v5338_v8 }
0x21ae   :  { %v4023_v19 = vmul.f32 -1.442695, %v4487_v29 }
0x21af   :  { %4737 = vtanh.f32 %v4488_v18  ;;  %v4024_v25 = vmul.f32 -1.442695, %v4488_v18 }
0x21b0   :  { %4739 = vpow2.f32 %v4023_v19 }
0x21b9   :  { %v4738_v30 = vpop.eup %4737 }
0x21ba   :  { %2588 = vrot.lane.b32.xlu0 %v4738_v30, %s4866_s3  ;;  %v4740_v41 = vpop.eup %4739 }
0x21bb   :  { %v2579_v42 = vadd.f32 1.0, %v4740_v41 }
0x21bd   :  { %4741 = vrcp.f32 %v2579_v42 }
0x21c7   :  { %v4742_v44 = vpop.eup %4741 }
0x21c8   :  { %v2586_v11 = vmul.f32 %v4742_v44, %v2484_v39 }
0x222c   :  { %v2589_v20 = vpop.permute.xlu0 %2588 }
0x222d   :  { %v2591_v51 = vmul.f32 %v4742_v44, %v2589_v20 }
0x222f   :  { %2593 = vrot.lane.b32.xlu1 %v2591_v51, %s4866_s3 }
0x22a1   :  { %v2594_v22 = vpop.permute.xlu1 %2593 }
0x22a2   :  { %v2596_v23 = vadd.f32 %v2594_v22, %v2586_v11 }
0x22a4   :  { %4743 = vtanh.f32 %v2596_v23 }
0x22a5   :  { %4745 = vpow2.f32 %v4024_v25 }
0x22ae   :  { %v4744_v24 = vpop.eup %4743 }
0x22af   :  { %2599 = vrot.lane.b32.xlu0 %v4744_v24, %s4866_s3  ;;  %v4746_v27 = vpop.eup %4745 }
0x22b0   :  { %v2580_v28 = vadd.f32 1.0, %v4746_v27 }
0x22b2   :  { %4747 = vrcp.f32 %v2580_v28 }
0x22bc   :  { %v4748_v31 = vpop.eup %4747 }
0x2321   :  { %v2600_v32 = vpop.permute.xlu0 %2599 }
0x2322   :  { %v2602_v35 = vmul.f32 %v4748_v31, %v2600_v32 }
0x2324   :  { %4025 = vmatmul.mubr.msk.f32.vlgmr.msra.gmra.mrb[14].mxu1 %vm445_vm2, %v2602_v35 }
0x23f7   :  { %v2678_v37 = vpop.f32.mrb[14].mxu1 }
0x23f8   :  { %v2680_v43 = vpop.f32.mrb[15].mxu1  ;;  %v4489_v52 = vadd.f32 %v2678_v37, %v4982_v14  ;;  %v2717_v14 = vld [vmem:[%s5586_s7 + $0x10] sm:$0xff] }
0x23f9   :  { %v4490_v47 = vadd.f32 %v2680_v43, %v5338_v8  ;;  %v2715_v8 = vld [vmem:[%s5586_s7] sm:$0xff]  ;;  %v4363_v57 = vpack.c.bf16 %v2718_v13, %v2717_v14  ;;  %s4869_s7 = smov [#allocation5]  }
0x23fa   :  { %v4026_v53 = vmul.f32 -1.442695, %v4489_v52  ;;  %v4360_v21 = vpack.c.bf16 %v2716_v55, %v2715_v8  ;;  %s72_s6 = sshll.u32 %s4869_s7, 4  ;;  %s73_s6 = int_to_ptr.vmem [resolvable:$true] %s72_s6 }
0x23fb   :  { %4749 = vtanh.f32 %v4490_v47  ;;  %v4027_v49 = vmul.f32 -1.442695, %v4490_v47 }
0x23fc   :  { %4751 = vpow2.f32 %v4026_v53  ;;  %4361 = vmatpush3.bf16.msra.mxu0 %v4360_v21 }
0x23fd   :  { %4362 = vmatprep.subr.bf16.mxu0 %v4867_v56 }
0x2400   :  { %4364 = vmatpush3.bf16.msra.mxu0 %v4363_v57 }
0x2401   :  { %4365 = vmatprep.subr.bf16.mxu0 %v4867_v56 }
0x2404   :  { %4367 = vmatpush3.bf16.msra.mxu0 %v4366_v60 }
0x2405   :  { %v4750_v48 = vpop.eup %4749  ;;  %4368 = vmatprep.subr.bf16.mxu0 %v4867_v56 }
0x2406   :  { %2700 = vrot.lane.b32.xlu1 %v4750_v48, %s4866_s3  ;;  %v4752_v54 = vpop.eup %4751 }
0x2407   :  { %v2691_v38 = vadd.f32 1.0, %v4752_v54 }
0x2408   :  { %4370 = vmatpush3.bf16.msra.mxu0 %v4369_v63 }
0x2409   :  { %4753 = vrcp.f32 %v2691_v38 }
0x2413   :  { %v4754_v36 = vpop.eup %4753 }
0x2414   :  { %v2698_v0 = vmul.f32 %v4754_v36, %v2596_v23 }
0x2478   :  { %v2701_v2 = vpop.permute.xlu1 %2700 }
0x2479   :  { %v2703_v26 = vmul.f32 %v4754_v36, %v2701_v2 }
0x247b   :  { %2705 = vrot.lane.b32.xlu0 %v2703_v26, %s4866_s3 }
0x24ed   :  { %v2706_v1 = vpop.permute.xlu0 %2705 }
0x24ee   :  { %v2708_v33 = vadd.f32 %v2706_v1, %v2698_v0 }
0x24f0   :  { %4755 = vtanh.f32 %v2708_v33 }
0x24f1   :  { %4757 = vpow2.f32 %v4027_v49 }
0x24fa   :  { %v4756_v5 = vpop.eup %4755 }
0x24fb   :  { %2711 = vrot.lane.b32.xlu1 %v4756_v5, %s4866_s3  ;;  %v4758_v34 = vpop.eup %4757 }
0x24fc   :  { %v2692_v39 = vadd.f32 1.0, %v4758_v34 }
0x24fe   :  { %4759 = vrcp.f32 %v2692_v39 }
0x2508   :  { %v4760_v40 = vpop.eup %4759 }
0x256d   :  { %v2712_v9 = vpop.permute.xlu1 %2711 }
0x256e   :  { %v2714_v10 = vmul.f32 %v4760_v40, %v2712_v9 }
0x2570   :  { %4069 = vmatmul.mubr.msk.f32.vlgmr.msra.gmra.mrb[16].mxu0 %vm445_vm2, %v2714_v10 }
0x2571   :  { %4815 = shalt.err (!%p4812_p4)  }
0x2572   :  { %s4816_s2 = scalar_lea.vmem %s73_s6, 11264  ;;  %p4821_p6 = scmp.lt.s32.totalorder %s73_s6, %s73_s6 }
0x2573   :  { %p4817_p5 = scmp.ne.s32.totalorder %s73_s6, %s4816_s2  ;;  %p4822_p7 = scmp.lt.s32.totalorder %s4816_s2, %s4816_s2 }
0x2575   :  { %p4823_p8 = por %p4822_p7, %p4821_p6 }
0x2577   :  { %p4824_p9 = pnand %p4823_p8, %p4817_p5 }
0x2579   :  { %4827 = shalt.err (!%p4824_p9)  }
0x257a   :  { %75 = dma.hbm_to_vmem [thread:$0]  %s5588_s9, 11264, %s73_s6, [#allocation6]  ;;  %v4028_v45 = vld [vmem:[%s5587_s8] ss:$0 sm:$0xff] }
0x2643   :  { %v2799_v12 = vpop.f32.mrb[16].mxu0 }
0x2644   :  { %v2800_v15 = vadd.f32 %v4028_v45, %v2799_v12  ;;  %v4070_v46 = vpop.f32.mrb[17].mxu0 }
0x2646   :  { %v5481_v16 = vmax.f32 %v2800_v15, 0.0 }
0x2647   :  { %4854 = dma.done.wait [#allocation6], 11264 }
0x2648   :  { %4855 = vsyncadd [#allocation6], 4294956032  ;;  %3080 = vmatprep.mubr.f32.mxu1 %v4865_v3  ;;  %3151 = vmatprep.mubr.f32.mxu0 %v4865_v3  ;;  %v2809_v17 = vld [vmem:[#allocation5 + $0x8] sm:$0xff]  ;;  %v2831_v18 = vld [vmem:[#allocation5 + $0xb8] sm:$0xff]  ;;  %vm3012_vm4 = vcmask 261120  }
0x2649   :  { %v2811_v30 = vld [vmem:[#allocation5 + $0x18] sm:$0xff]  ;;  %v4371_v29 = vpack.c.bf16 %v2831_v18, %v2809_v17  ;;  %v2833_v19 = vld [vmem:[#allocation5 + $0xc8] sm:$0xff]  ;;  %v2808_v41 = vld [vmem:[#allocation5] sm:$0xff] }
0x264a   :  { %v2830_v42 = vld [vmem:[#allocation5 + $0xb0] sm:$0xff]  ;;  %v4379_v44 = vpack.c.bf16 %v2833_v19, %v2811_v30  ;;  %v2832_v11 = vld [vmem:[#allocation5 + $0xc0] sm:$0xff]  ;;  %v2853_v22 = vld [vmem:[#allocation5 + $0x168] sm:$0xff] }
0x264b   :  { %v4373_v20 = vpack.c.bf16 %v2830_v42, %v2808_v41  ;;  %v2810_v51 = vld [vmem:[#allocation5 + $0x10] sm:$0xff]  ;;  %4372 = vmatprep.subr.bf16.mxu1 %v4371_v29  ;;  %v2875_v24 = vld [vmem:[#allocation5 + $0x218] sm:$0xff]  ;;  %v2877_v27 = vld [vmem:[#allocation5 + $0x228] sm:$0xff] }
0x264c   :  { %v4381_v23 = vpack.c.bf16 %v2832_v11, %v2810_v51  ;;  %v2855_v25 = vld [vmem:[#allocation5 + $0x178] sm:$0xff]  ;;  %4380 = vmatprep.subr.bf16.mxu0 %v4379_v44  ;;  %v4375_v28 = vpack.c.bf16 %v2875_v24, %v2853_v22  ;;  %v2852_v32 = vld [vmem:[#allocation5 + $0x160] sm:$0xff]  ;;  %v2874_v35 = vld [vmem:[#allocation5 + $0x210] sm:$0xff] }
0x264d   :  { %4374 = vmatpush1.bf16.msra.mxu1 %v4373_v20  ;;  %v4383_v31 = vpack.c.bf16 %v2877_v27, %v2855_v25  ;;  %v2854_v37 = vld [vmem:[#allocation5 + $0x170] sm:$0xff]  ;;  %v4377_v43 = vpack.c.bf16 %v2874_v35, %v2852_v32  ;;  %v2876_v47 = vld [vmem:[#allocation5 + $0x220] sm:$0xff]  ;;  %v2813_v48 = vld [vmem:[#allocation5 + $0x28] sm:$0xff] }
0x264e   :  { %4382 = vmatpush1.bf16.msra.mxu0 %v4381_v23  ;;  %v2835_v52 = vld [vmem:[#allocation5 + $0xd8] sm:$0xff]  ;;  %4376 = vmatprep.subr.bf16.mxu1 %v4375_v28  ;;  %v4385_v53 = vpack.c.bf16 %v2876_v47, %v2854_v37  ;;  %v2837_v36 = vld [vmem:[#allocation5 + $0xe8] sm:$0xff]  ;;  %v2812_v2 = vld [vmem:[#allocation5 + $0x20] sm:$0xff] }
0x264f   :  { %4384 = vmatprep.subr.bf16.mxu0 %v4383_v31  ;;  %v4387_v54 = vpack.c.bf16 %v2835_v52, %v2813_v48  ;;  %v2815_v38 = vld [vmem:[#allocation5 + $0x38] sm:$0xff]  ;;  %v2834_v8 = vld [vmem:[#allocation5 + $0xd0] sm:$0xff]  ;;  %v2836_v14 = vld [vmem:[#allocation5 + $0xe0] sm:$0xff] }
0x2650   :  { %v4395_v26 = vpack.c.bf16 %v2837_v36, %v2815_v38  ;;  %v2814_v55 = vld [vmem:[#allocation5 + $0x30] sm:$0xff]  ;;  %v4389_v56 = vpack.c.bf16 %v2834_v8, %v2812_v2  ;;  %v2857_v21 = vld [vmem:[#allocation5 + $0x188] sm:$0xff]  ;;  %v2879_v13 = vld [vmem:[#allocation5 + $0x238] sm:$0xff] }
0x2651   :  { %4378 = vmatpush1.bf16.msra.mxu1 %v4377_v43  ;;  %v2859_v57 = vld [vmem:[#allocation5 + $0x198] sm:$0xff]  ;;  %v4397_v58 = vpack.c.bf16 %v2836_v14, %v2814_v55  ;;  %v4391_v59 = vpack.c.bf16 %v2879_v13, %v2857_v21  ;;  %v2881_v60 = vld [vmem:[#allocation5 + $0x248] sm:$0xff]  ;;  %v2856_v61 = vld [vmem:[#allocation5 + $0x180] sm:$0xff] }
0x2652   :  { %4386 = vmatpush1.bf16.msra.mxu0 %v4385_v53  ;;  %4388 = vmatprep.subr.bf16.mxu1 %v4387_v54  ;;  %v2878_v62 = vld [vmem:[#allocation5 + $0x230] sm:$0xff]  ;;  %v4399_v63 = vpack.c.bf16 %v2881_v60, %v2859_v57  ;;  %v2880_v1 = vld [vmem:[#allocation5 + $0x240] sm:$0xff]  ;;  %v2817_v33 = vld [vmem:[#allocation5 + $0x48] sm:$0xff] }
0x2653   :  { %4396 = vmatprep.subr.bf16.mxu0 %v4395_v26  ;;  %v2858_v0 = vld [vmem:[#allocation5 + $0x190] sm:$0xff]  ;;  %v2839_v5 = vld [vmem:[#allocation5 + $0xf8] sm:$0xff]  ;;  %v2841_v34 = vld [vmem:[#allocation5 + $0x108] sm:$0xff]  ;;  %v4393_v39 = vpack.c.bf16 %v2878_v62, %v2856_v61 }
0x2654   :  { %4030 = vmatmul.mubr.msk.f32.vlgmr.msra.gmra.mrb[16].mxu1 %vm3012_vm4, %v5481_v16  ;;  %v2819_v49 = vld [vmem:[#allocation5 + $0x58] sm:$0xff]  ;;  %v4401_v40 = vpack.c.bf16 %v2880_v1, %v2858_v0  ;;  %v4403_v9 = vpack.c.bf16 %v2839_v5, %v2817_v33  ;;  %v2816_v10 = vld [vmem:[#allocation5 + $0x40] sm:$0xff]  ;;  %v2838_v45 = vld [vmem:[#allocation5 + $0xf0] sm:$0xff] }
0x2655   :  { %4031 = vmatmul.mubr.msk.f32.vlgmr.msra.gmra.mrb[18].mxu0 %vm3012_vm4, %v5481_v16  ;;  %4390 = vmatpush1.bf16.msra.mxu1 %v4389_v56  ;;  %v2818_v12 = vld [vmem:[#allocation5 + $0x50] sm:$0xff]  ;;  %v4411_v15 = vpack.c.bf16 %v2841_v34, %v2819_v49  ;;  %v2840_v46 = vld [vmem:[#allocation5 + $0x100] sm:$0xff]  ;;  %v2861_v17 = vld [vmem:[#allocation5 + $0x1a8] sm:$0xff]  ;;  %v4405_v19 = vpack.c.bf16 %v2838_v45, %v2816_v10 }
0x2656   :  { %4398 = vmatpush1.bf16.msra.mxu0 %v4397_v58  ;;  %4392 = vmatprep.subr.bf16.mxu1 %v4391_v59  ;;  %v2883_v18 = vld [vmem:[#allocation5 + $0x258] sm:$0xff]  ;;  %v2885_v29 = vld [vmem:[#allocation5 + $0x268] sm:$0xff]  ;;  %v4413_v41 = vpack.c.bf16 %v2840_v46, %v2818_v12  ;;  %v2860_v44 = vld [vmem:[#allocation5 + $0x1a0] sm:$0xff] }
0x2657   :  { %4400 = vmatprep.subr.bf16.mxu0 %v4399_v63  ;;  %3222 = vmatprep.mubr.f32.mxu1 %v4865_v3  ;;  %v2863_v30 = vld [vmem:[#allocation5 + $0x1b8] sm:$0xff]  ;;  %v4407_v42 = vpack.c.bf16 %v2883_v18, %v2861_v17  ;;  %v2882_v20 = vld [vmem:[#allocation5 + $0x250] sm:$0xff]  ;;  %v2884_v22 = vld [vmem:[#allocation5 + $0x260] sm:$0xff] }
0x2658   :  { %3293 = vmatprep.mubr.f32.mxu0 %v4865_v3  ;;  %v2862_v51 = vld [vmem:[#allocation5 + $0x1b0] sm:$0xff]  ;;  %v4415_v11 = vpack.c.bf16 %v2885_v29, %v2863_v30  ;;  %v2821_v23 = vld [vmem:[#allocation5 + $0x68] sm:$0xff]  ;;  %v2843_v24 = vld [vmem:[#allocation5 + $0x118] sm:$0xff]  ;;  %v4409_v28 = vpack.c.bf16 %v2882_v20, %v2860_v44 }
0x2659   :  { %4394 = vmatpush1.bf16.msra.mxu1 %v4393_v39  ;;  %v2823_v25 = vld [vmem:[#allocation5 + $0x78] sm:$0xff]  ;;  %v2845_v27 = vld [vmem:[#allocation5 + $0x128] sm:$0xff]  ;;  %v4417_v31 = vpack.c.bf16 %v2884_v22, %v2862_v51  ;;  %v4419_v32 = vpack.c.bf16 %v2843_v24, %v2821_v23  ;;  %v2820_v35 = vld [vmem:[#allocation5 + $0x60] sm:$0xff] }
0x265a   :  { %4402 = vmatpush1.bf16.msra.mxu0 %v4401_v40  ;;  %4404 = vmatprep.subr.bf16.mxu1 %v4403_v9  ;;  %v2842_v37 = vld [vmem:[#allocation5 + $0x110] sm:$0xff]  ;;  %v4427_v47 = vpack.c.bf16 %v2845_v27, %v2823_v25  ;;  %v2844_v48 = vld [vmem:[#allocation5 + $0x120] sm:$0xff]  ;;  %v2865_v52 = vld [vmem:[#allocation5 + $0x1c8] sm:$0xff] }
0x265b   :  { %4412 = vmatprep.subr.bf16.mxu0 %v4411_v15  ;;  %v2822_v43 = vld [vmem:[#allocation5 + $0x70] sm:$0xff]  ;;  %v2887_v53 = vld [vmem:[#allocation5 + $0x278] sm:$0xff]  ;;  %v2889_v38 = vld [vmem:[#allocation5 + $0x288] sm:$0xff]  ;;  %v4421_v36 = vpack.c.bf16 %v2842_v37, %v2820_v35 }
0x265c   :  { %4032 = vmatmul.mubr.msk.f32.vlgmr.msra.gmra.mrb[18].mxu1 %vm3012_vm4, %v5481_v16  ;;  %v2867_v54 = vld [vmem:[#allocation5 + $0x1d8] sm:$0xff]  ;;  %v4429_v2 = vpack.c.bf16 %v2844_v48, %v2822_v43  ;;  %v4423_v26 = vpack.c.bf16 %v2887_v53, %v2865_v52  ;;  %v2864_v8 = vld [vmem:[#allocation5 + $0x1c0] sm:$0xff]  ;;  %v2886_v55 = vld [vmem:[#allocation5 + $0x270] sm:$0xff]  ;;  %v5530_v53 = vsub.s32 4, %v4957_v4 }
0x265d   :  { %4033 = vmatmul.mubr.msk.f32.vlgmr.msra.gmra.mrb[20].mxu0 %vm3012_vm4, %v5481_v16  ;;  %4406 = vmatpush1.bf16.msra.mxu1 %v4405_v19  ;;  %v2866_v14 = vld [vmem:[#allocation5 + $0x1d0] sm:$0xff]  ;;  %v4431_v56 = vpack.c.bf16 %v2889_v38, %v2867_v54  ;;  %v2888_v21 = vld [vmem:[#allocation5 + $0x280] sm:$0xff]  ;;  %v2825_v13 = vld [vmem:[#allocation5 + $0x88] sm:$0xff]  ;;  %v4425_v60 = vpack.c.bf16 %v2886_v55, %v2864_v8  ;;  %v2932_v55 = vsub.s32 7, %v4957_v4 }
0x265e   :  { %4414 = vmatpush1.bf16.msra.mxu0 %v4413_v41  ;;  %4408 = vmatprep.subr.bf16.mxu1 %v4407_v42  ;;  %v2847_v57 = vld [vmem:[#allocation5 + $0x138] sm:$0xff]  ;;  %v2849_v59 = vld [vmem:[#allocation5 + $0x148] sm:$0xff]  ;;  %v4433_v61 = vpack.c.bf16 %v2888_v21, %v2866_v14  ;;  %v2824_v63 = vld [vmem:[#allocation5 + $0x80] sm:$0xff] }
0x265f   :  { %4416 = vmatprep.subr.bf16.mxu0 %v4415_v11  ;;  %3364 = vmatprep.mubr.f32.mxu1 %v4865_v3  ;;  %v2827_v58 = vld [vmem:[#allocation5 + $0x98] sm:$0xff]  ;;  %v4435_v62 = vpack.c.bf16 %v2847_v57, %v2825_v13  ;;  %v2846_v0 = vld [vmem:[#allocation5 + $0x130] sm:$0xff]  ;;  %v2848_v5 = vld [vmem:[#allocation5 + $0x140] sm:$0xff] }
0x2660   :  { %3435 = vmatprep.mubr.f32.mxu0 %v4865_v3  ;;  %v2826_v1 = vld [vmem:[#allocation5 + $0x90] sm:$0xff]  ;;  %v4443_v33 = vpack.c.bf16 %v2849_v59, %v2827_v58  ;;  %v2869_v49 = vld [vmem:[#allocation5 + $0x1e8] sm:$0xff]  ;;  %v2891_v34 = vld [vmem:[#allocation5 + $0x298] sm:$0xff]  ;;  %v4437_v9 = vpack.c.bf16 %v2846_v0, %v2824_v63 }
0x2661   :  { %4410 = vmatpush1.bf16.msra.mxu1 %v4409_v28  ;;  %v2871_v39 = vld [vmem:[#allocation5 + $0x1f8] sm:$0xff]  ;;  %v2893_v40 = vld [vmem:[#allocation5 + $0x2a8] sm:$0xff]  ;;  %v4445_v10 = vpack.c.bf16 %v2848_v5, %v2826_v1  ;;  %v4439_v45 = vpack.c.bf16 %v2891_v34, %v2869_v49  ;;  %v2868_v12 = vld [vmem:[#allocation5 + $0x1e0] sm:$0xff] }
0x2662   :  { %4418 = vmatpush1.bf16.msra.mxu0 %v4417_v31  ;;  %4420 = vmatprep.subr.bf16.mxu1 %v4419_v32  ;;  %v2890_v15 = vld [vmem:[#allocation5 + $0x290] sm:$0xff]  ;;  %v4447_v17 = vpack.c.bf16 %v2893_v40, %v2871_v39  ;;  %v2892_v18 = vld [vmem:[#allocation5 + $0x2a0] sm:$0xff]  ;;  %v2829_v30 = vld [vmem:[#allocation5 + $0xa8] sm:$0xff]  ;;  %v5520_v31 = vsub.s32 2, %v4957_v4  ;;  %v5523_v32 = vsub.s32 3, %v4957_v4 }
0x2663   :  { %4428 = vmatprep.subr.bf16.mxu0 %v4427_v47  ;;  %v2870_v46 = vld [vmem:[#allocation5 + $0x1f0] sm:$0xff]  ;;  %v2851_v29 = vld [vmem:[#allocation5 + $0x158] sm:$0xff]  ;;  %v4441_v19 = vpack.c.bf16 %v2890_v15, %v2868_v12  ;;  %v2828_v44 = vld [vmem:[#allocation5 + $0xa0] sm:$0xff] }
0x2664   :  { %4034 = vmatmul.mubr.msk.f32.vlgmr.msra.gmra.mrb[20].mxu1 %vm3012_vm4, %v5481_v16  ;;  %v4449_v41 = vpack.c.bf16 %v2892_v18, %v2870_v46  ;;  %v4451_v42 = vpack.c.bf16 %v2851_v29, %v2829_v30  ;;  %v2850_v20 = vld [vmem:[#allocation5 + $0x150] sm:$0xff]  ;;  %v2873_v51 = vld [vmem:[#allocation5 + $0x208] sm:$0xff]  ;;  %v2895_v11 = vld [vmem:[#allocation5 + $0x2b8] sm:$0xff] }
0x2665   :  { %4035 = vmatmul.mubr.msk.f32.vlgmr.msra.gmra.mrb[22].mxu0 %vm3012_vm4, %v5481_v16  ;;  %4422 = vmatpush1.bf16.msra.mxu1 %v4421_v36  ;;  %v4453_v22 = vpack.c.bf16 %v2850_v20, %v2828_v44  ;;  %v4455_v23 = vpack.c.bf16 %v2895_v11, %v2873_v51  ;;  %v2872_v24 = vld [vmem:[#allocation5 + $0x200] sm:$0xff]  ;;  %v2894_v25 = vld [vmem:[#allocation5 + $0x2b0] sm:$0xff]  ;;  %v2897_v49 = vld [vmem:[%s5589_s10 + $0x8] sm:$0xff] }
0x2666   :  { %4430 = vmatpush1.bf16.msra.mxu0 %v4429_v2  ;;  %4424 = vmatprep.subr.bf16.mxu1 %v4423_v26  ;;  %v4457_v27 = vpack.c.bf16 %v2894_v25, %v2872_v24  ;;  %v2896_v28 = vld [vmem:[%s5589_s10] sm:$0xff]  ;;  %v2928_v2 = vsub.s32 6, %v4957_v4  ;;  %v5534_v26 = vsub.s32 5, %v4957_v4  ;;  %v2941_v12 = vrot.slane %v2897_v49, %v5125_v50 }
0x2667   :  { %4432 = vmatprep.subr.bf16.mxu0 %v4431_v56  ;;  %3506 = vmatprep.mubr.f32.mxu1 %v4865_v3  ;;  %v2905_v35 = vrot.slane %v2896_v28, %v4960_v6  ;;  %v2913_v37 = vrot.slane %v2896_v28, %v5520_v31  ;;  %v2917_v43 = vrot.slane %v2896_v28, %v5523_v32 }
0x2668   :  { %3577 = vmatprep.mubr.f32.mxu0 %v4865_v3  ;;  %v2921_v21 = vrot.slane %v2896_v28, %v5530_v53  ;;  %v2929_v57 = vrot.slane %v2896_v28, %v2928_v2  ;;  %v2925_v58 = vrot.slane %v2896_v28, %v5534_v26  ;;  %v2949_v46 = vrot.slane %v2897_v49, %v5523_v32 }
0x2669   :  { %4426 = vmatpush1.bf16.msra.mxu1 %v4425_v60  ;;  %v2933_v60 = vrot.slane %v2896_v28, %v2932_v55  ;;  %v2961_v24 = vrot.slane %v2897_v49, %v2928_v2  ;;  %v2957_v25 = vrot.slane %v2897_v49, %v5534_v26 }
0x266a   :  { %4434 = vmatpush1.bf16.msra.mxu0 %v4433_v61  ;;  %4436 = vmatprep.subr.bf16.mxu1 %v4435_v62 }
0x266b   :  { %4444 = vmatprep.subr.bf16.mxu0 %v4443_v33 }
0x266c   :  { %4036 = vmatmul.mubr.msk.f32.vlgmr.msra.gmra.mrb[22].mxu1 %vm3012_vm4, %v5481_v16 }
0x266d   :  { %4037 = vmatmul.mubr.msk.f32.vlgmr.msra.gmra.mrb[24].mxu0 %vm3012_vm4, %v5481_v16  ;;  %4438 = vmatpush1.bf16.msra.mxu1 %v4437_v9  ;;  %v2937_v9 = vrot.slane %v2897_v49, %v4960_v6 }
0x266e   :  { %4446 = vmatpush1.bf16.msra.mxu0 %v4445_v10  ;;  %4440 = vmatprep.subr.bf16.mxu1 %v4439_v45  ;;  %v2945_v45 = vrot.slane %v2897_v49, %v5520_v31 }
0x266f   :  { %4448 = vmatprep.subr.bf16.mxu0 %v4447_v17  ;;  %3648 = vmatprep.mubr.f32.mxu1 %v4865_v3 }
0x2670   :  { %3719 = vmatprep.mubr.f32.mxu0 %v4865_v3 }
0x2671   :  { %4442 = vmatpush1.bf16.msra.mxu1 %v4441_v19 }
0x2672   :  { %4450 = vmatpush1.bf16.msra.mxu0 %v4449_v41  ;;  %4452 = vmatprep.subr.bf16.mxu1 %v4451_v42 }
0x2674   :  { %4038 = vmatmul.mubr.msk.f32.vlgmr.msra.gmra.mrb[24].mxu1 %vm3012_vm4, %v5481_v16 }
0x2675   :  { %4039 = vmatmul.mubr.msk.f32.vlgmr.msra.gmra.mrb[26].mxu0 %vm3012_vm4, %v5481_v16  ;;  %4454 = vmatpush1.bf16.msra.mxu1 %v4453_v22  ;;  %v2953_v22 = vrot.slane %v2897_v49, %v5530_v53 }
0x2676   :  { %4456 = vmatprep.subr.bf16.mxu1 %v4455_v23  ;;  %3790 = vmatprep.mubr.f32.mxu1 %v4865_v3  ;;  %v2909_v3 = vrot.slane %v2896_v28, %v5125_v50  ;;  %v2965_v28 = vrot.slane %v2897_v49, %v2932_v55 }
0x2679   :  { %4458 = vmatpush1.bf16.msra.mxu1 %v4457_v27 }
0x267c   :  { %4040 = vmatmul.mubr.msk.f32.vlgmr.msra.gmra.mrb[26].mxu1 %vm3012_vm4, %v5481_v16 }
0x2727   :  { %v3082_v47 = vpop.f32.mrb[16].mxu1 }
0x2728   :  { %v3083_v16 = vadd.f32 %v3082_v47, %v2905_v35  ;;  %v3153_v48 = vpop.f32.mrb[18].mxu0  ;;  %v3084_v52 = vpop.f32.mrb[17].mxu1 }
0x2729   :  { %v3154_v54 = vadd.f32 %v3153_v48, %v2913_v37  ;;  %v3085_v38 = vadd.f32 %v3084_v52, %v2909_v3  ;;  %v3155_v36 = vpop.f32.mrb[19].mxu0 }
0x272a   :  { %v3156_v8 = vadd.f32 %v3155_v36, %v2917_v43 }
0x272b   :  { %v3819_v14 = vcombine.low %v3083_v16, %v3085_v38 }
0x272c   :  { %v3820_v56 = vcombine.low %v3154_v54, %v3156_v8  ;;  %v2898_v54 = vld [vmem:[%s5589_s10 + $0x10] sm:$0x3f]  ;;  %s4870_s10 = smov [#allocation12]  }
0x272d   :  { %v3827_v13 = vrot.slane %v3819_v14, %v4963_v7  ;;  %v2969_v8 = vrot.slane %v2898_v54, %v4960_v6  ;;  %v2977_v14 = vrot.slane %v2898_v54, %v5520_v31  ;;  %v2985_v31 = vrot.slane %v2898_v54, %v5530_v53  ;;  %s3930_s17 = sshll.u32 %s4870_s10, 4  ;;  %s3931_s17 = int_to_ptr.vmem [resolvable:$true] %s3930_s17 }
0x272e   :  { %v3834_v59 = vrot.slane %v3820_v56, %v4963_v7  ;;  %v2973_v56 = vrot.slane %v2898_v54, %v5125_v50  ;;  %s4828_s19 = scalar_lea.vmem %s3931_s17, 704  ;;  %p4833_p11 = scmp.lt.s32.totalorder %s3931_s17, %s3931_s17 }
0x272f   :  { %v3224_v61 = vpop.f32.mrb[18].mxu1  ;;  %p4829_p10 = scmp.ne.s32.totalorder %s3931_s17, %s4828_s19  ;;  %p4834_p12 = scmp.lt.s32.totalorder %s4828_s19, %s4828_s19 }
0x2730   :  { %v3835_v62 = vcombine.low %v3827_v13, %v3834_v59  ;;  %v3225_v63 = vadd.f32 %v3224_v61, %v2921_v21  ;;  %v3295_v0 = vpop.f32.mrb[20].mxu0  ;;  %v3226_v1 = vpop.f32.mrb[19].mxu1  ;;  %v2981_v13 = vrot.slane %v2898_v54, %v5523_v32 }
0x2731   :  { %v3296_v33 = vadd.f32 %v3295_v0, %v2929_v57  ;;  %v3227_v5 = vadd.f32 %v3226_v1, %v2925_v58  ;;  %v3297_v4 = vpop.f32.mrb[21].mxu0  ;;  %p4835_p13 = por %p4834_p12, %p4833_p11 }
0x2732   :  { %3918 = vst [vmem:[#allocation12] sm:$0xff] %v3835_v62  ;;  %v3298_v34 = vadd.f32 %v3297_v4, %v2933_v60 }
0x2733   :  { %v3836_v39 = vcombine.low %v3225_v63, %v3227_v5  ;;  %v2989_v5 = vrot.slane %v2898_v54, %v5534_v26  ;;  %p4836_p0 = pnand %p4835_p13, %p4829_p10 }
0x2734   :  { %v3837_v40 = vcombine.low %v3296_v33, %v3298_v34 }
0x2735   :  { %v3844_v10 = vrot.slane %v3836_v39, %v4963_v7 }
0x2736   :  { %v3851_v15 = vrot.slane %v3837_v40, %v4963_v7 }
0x2737   :  { %v3366_v17 = vpop.f32.mrb[20].mxu1 }
0x2738   :  { %v3852_v18 = vcombine.low %v3844_v10, %v3851_v15  ;;  %v3367_v30 = vadd.f32 %v3366_v17, %v2937_v9  ;;  %v3437_v29 = vpop.f32.mrb[22].mxu0  ;;  %v3368_v19 = vpop.f32.mrb[21].mxu1 }
0x2739   :  { %v3438_v41 = vadd.f32 %v3437_v29, %v2945_v45  ;;  %v3369_v42 = vadd.f32 %v3368_v19, %v2941_v12  ;;  %v3439_v44 = vpop.f32.mrb[23].mxu0 }
0x273a   :  { %3919 = vst [vmem:[#allocation12 + $0x8] sm:$0xff] %v3852_v18  ;;  %v3440_v20 = vadd.f32 %v3439_v44, %v2949_v46 }
0x273b   :  { %v3853_v51 = vcombine.low %v3367_v30, %v3369_v42 }
0x273c   :  { %v3854_v11 = vcombine.low %v3438_v41, %v3440_v20 }
0x273d   :  { %v3861_v23 = vrot.slane %v3853_v51, %v4963_v7 }
0x273e   :  { %v3868_v27 = vrot.slane %v3854_v11, %v4963_v7 }
0x273f   :  { %v3508_v35 = vpop.f32.mrb[22].mxu1 }
0x2740   :  { %v3869_v37 = vcombine.low %v3861_v23, %v3868_v27  ;;  %v3509_v3 = vadd.f32 %v3508_v35, %v2953_v22  ;;  %v3579_v43 = vpop.f32.mrb[24].mxu0  ;;  %v3510_v47 = vpop.f32.mrb[23].mxu1 }
0x2741   :  { %v3580_v16 = vadd.f32 %v3579_v43, %v2961_v24  ;;  %v3511_v48 = vadd.f32 %v3510_v47, %v2957_v25  ;;  %v3581_v52 = vpop.f32.mrb[25].mxu0 }
0x2742   :  { %3920 = vst [vmem:[#allocation12 + $0x10] sm:$0xff] %v3869_v37  ;;  %v3582_v38 = vadd.f32 %v3581_v52, %v2965_v28 }
0x2743   :  { %v3870_v36 = vcombine.low %v3509_v3, %v3511_v48 }
0x2744   :  { %v3871_v2 = vcombine.low %v3580_v16, %v3582_v38 }
0x2745   :  { %v3878_v55 = vrot.slane %v3870_v36, %v4963_v7 }
0x2746   :  { %v3885_v21 = vrot.slane %v3871_v2, %v4963_v7 }
0x2747   :  { %v3650_v57 = vpop.f32.mrb[24].mxu1 }
0x2748   :  { %v3886_v58 = vcombine.low %v3878_v55, %v3885_v21  ;;  %v3651_v59 = vadd.f32 %v3650_v57, %v2969_v8  ;;  %v3721_v60 = vpop.f32.mrb[26].mxu0  ;;  %v3652_v61 = vpop.f32.mrb[25].mxu1 }
0x2749   :  { %v3722_v62 = vadd.f32 %v3721_v60, %v2977_v14  ;;  %v3653_v63 = vadd.f32 %v3652_v61, %v2973_v56  ;;  %v3723_v0 = vpop.f32.mrb[27].mxu0 }
0x274a   :  { %3921 = vst [vmem:[#allocation12 + $0x18] sm:$0xff] %v3886_v58  ;;  %v3724_v6 = vadd.f32 %v3723_v0, %v2981_v13 }
0x274b   :  { %v3887_v1 = vcombine.low %v3651_v59, %v3653_v63 }
0x274c   :  { %v3888_v33 = vcombine.low %v3722_v62, %v3724_v6 }
0x274d   :  { %v3895_v50 = vrot.slane %v3887_v1, %v4963_v7 }
0x274e   :  { %v3902_v32 = vrot.slane %v3888_v33, %v4963_v7 }
0x274f   :  { %v3792_v4 = vpop.f32.mrb[26].mxu1 }
0x2750   :  { %v3903_v49 = vcombine.low %v3895_v50, %v3902_v32  ;;  %v3793_v34 = vadd.f32 %v3792_v4, %v2985_v31  ;;  %v3794_v39 = vpop.f32.mrb[27].mxu1 }
0x2751   :  { %v3795_v40 = vadd.f32 %v3794_v39, %v2989_v5 }
0x2752   :  { %3922 = vst [vmem:[#allocation12 + $0x20] sm:$0xff] %v3903_v49 }
0x2753   :  { %v3904_v9 = vcombine.low %v3793_v34, %v3795_v40 }
0x2755   :  { %4041 = vst.sshfl [vmem:[#allocation12 + $0x28] sm:$0x33 pattern:$0x76325410] %v3904_v9 }
0x2756   :  { %4839 = shalt.err (!%p4836_p0)
}
0x2757   :  { %s4840_s22 = scalar_lea.hbm %s5590_s11, 704 }
0x2758   :  { %p4841_p1 = scmp.ne.s32.totalorder %s5590_s11, %s4840_s22  ;;  %p4844_p2 = scmp.lt.u32.totalorder %s4840_s22, %s5590_s11 }
0x275a   :  { %p4846_p3 = pnand %p4844_p2, %p4841_p1 }
0x275c   :  { %4849 = shalt.err (!%p4846_p3)
}
0x275d   :  { %3933 = dma.vmem_to_hbm [thread:$0]  %s3931_s17, 704, %s5590_s11, [#allocation9]  }
0x275e   :  { %4856 = dma.done.wait [#allocation9], 704  }
0x275f   :  { %4857 = vsyncadd [#allocation9], 4294966592 }
0x2760   :  { %3937 = vsyncpa [#allocation8], 1 }
0x2761   :  { %3938 = vsyncpa [#allocation11], 1 }
0x2762   :  { %3939 = vsyncpa [#allocation9], 1 }
0x2763   :  { %3940 = vsyncmov [#allocation6] }
0x2766   :  { %s3941_s25 = vpop.sfrf %3940 }
0x2767   :  { %p4042_p4 = scmp.ne.s32.totalorder %s3941_s25, 0 }
0x2769   :  { %3945 = shalt.err (%p4042_p4)  }

</bundles_post_ra>
